<compile_context>
chip_gen: v7x
topology: tpu7x:2x2x1
jax: 0.10.0
libtpu: 0.0.40
codegen_flags: <defaults>
</compile_context>

<pallas_src>
import functools

import numpy as np
import jax
import jax.numpy as jnp
from jax.experimental import pallas as pl
from jax.experimental.pallas import tpu as pltpu

TOKENS_PER_SECOND = 50.0
FILTER_WIDTH = 7            # module constant
PAD = FILTER_WIDTH // 2     # reflect-pad width = 3
QK_SCALE = 1.0              # module constant


# ---------------------------------------------------------------------------
# Median-of-7 via a 13-compare-exchange selection network (Devillard).
# Equivalent to sort(7 taps)[..., 3] with far fewer min/max (VPU) ops.
# ---------------------------------------------------------------------------
def _median7(vals):
    v = list(vals)
    for i, j in ((0, 5), (0, 3), (1, 6), (2, 4), (0, 1), (3, 5), (2, 6),
                 (2, 3), (3, 6), (4, 5), (1, 4), (1, 3), (3, 4)):
        lo = jnp.minimum(v[i], v[j])
        hi = jnp.maximum(v[i], v[j])
        v[i], v[j] = lo, hi
    return v[3]


# ---------------------------------------------------------------------------
# Fused Pallas kernel: one batch element per grid step, all heads inside.
#   refs = (w_ref_0, ..., w_ref_{A-1}, o_ref); each w_ref block is
#   (1, 1, T_blk, F) sliced from its source QK tensor by the BlockSpec.
# ---------------------------------------------------------------------------
def _fused_kernel(*refs, sot, tc, num_heads):
    w_refs = refs[:num_heads]
    o_ref = refs[num_heads]
    tp = o_ref.shape[1]
    f = o_ref.shape[2]

    # Lane-index masks for the PAD reflected columns on each frame-axis edge.
    # Computed once per grid step (head-independent).
    lane = jax.lax.broadcasted_iota(jnp.int32, (1, f), 1)
    left_mask = [lane == j for j in range(PAD)]                 # cols 0..2
    right_mask = [lane == (f - 1 - j) for j in range(PAD)]      # cols F-1..F-3

    acc = None
    for h in range(num_heads):
        w = w_refs[h][0, 0].astype(jnp.float32)                 # [T_blk, F]
        if w.shape[0] != tc:
            w = w[:tc, :]                                       # [Tc, F]
        if QK_SCALE != 1.0:
            w = w * QK_SCALE

        # softmax over frames (lane axis); exact reciprocal (per-row scalar).
        m = jnp.max(w, axis=-1, keepdims=True)
        e = jnp.exp(w - m)
        p = e * (1.0 / jnp.sum(e, axis=-1, keepdims=True))

        # per-frame std/mean normalization over tokens. No epsilon, exactly
        # like torch.std_mean(..., unbiased=False) followed by a divide.
        mean = jnp.mean(p, axis=0, keepdims=True)
        cent = p - mean
        z = cent * jax.lax.rsqrt(jnp.mean(cent * cent, axis=0, keepdims=True))

        # 7 median-filter taps as in-register circular lane rotations
        # (raw[k][:, j] == z[:, (j + k - 3) mod F]); XLU slot, no VMEM scratch.
        raw = []
        for k in range(FILTER_WIDTH):
            d = k - PAD
            raw.append(z if d == 0 else pltpu.roll(z, shift=(-d) % f, axis=1))

        # Reflect-pad boundary fix: at the PAD left / PAD right columns the
        # reflected value equals another (interior-valid) circular tap at the
        # same column, so patch with selects over the precomputed lane masks.
        taps = list(raw)
        for k in range(PAD):                       # taps looking left (d < 0)
            t = taps[k]
            for j in range(PAD - k):               # boundary columns 0..-d-1
                t = jnp.where(left_mask[j], raw[6 - 2 * j - k], t)
            taps[k] = t
        for k in range(PAD + 1, FILTER_WIDTH):     # taps looking right (d > 0)
            t = taps[k]
            for j in range(k - PAD):               # boundary columns F-1-j
                t = jnp.where(right_mask[j], raw[6 + 2 * j - k], t)
            taps[k] = t

        med = _median7(taps)                       # [Tc, F]
        acc = med if acc is None else acc + med    # first-head write-through

    # -mean over alignment heads; token rows [sot, sot+Tp) == matrix[:, sot:-1].
    # Single sublane-offset slice per batch element (not per head).
    o_ref[0] = -(acc[sot:sot + tp, :] * (1.0 / num_heads))


# ---------------------------------------------------------------------------
# DTW (wavefront DP) + backtrace + jump extraction, in plain JAX.
# ---------------------------------------------------------------------------
def _dtw_jump_times(x):
    """x: [N, M] float32 cost matrix. Returns [N] float32 jump times (seconds)."""
    # TODO(synk): the DTW cost DP + backtrace is an inherently sequential,
    # data-dependent scalar algorithm; it stays in plain JAX (anti-diagonal
    # wavefront lax.scan + fori_loop backtrace) rather than a Pallas kernel.
    n, m = x.shape
    inf = jnp.float32(jnp.inf)
    w = n + 1                                     # diagonal length (i = 0..n)
    ncols = n + m - 1

    # Skew x so that skewed column (d - 2) holds x[i-1, d-i-1] at row i-1.
    xpad = jnp.pad(x, ((0, 0), (0, n)), constant_values=0.0)     # [n, m+n]
    col = (jnp.arange(ncols)[None, :] - jnp.arange(n)[:, None]) % (m + n)
    xs = jnp.take_along_axis(xpad, col, axis=1)                  # [n, ncols]

    i_idx = jnp.arange(w, dtype=jnp.int32)
    diag0 = jnp.where(i_idx == 0, jnp.float32(0.0), inf)         # d = 0 (cost[0][0]=0)
    diag1 = jnp.full((w,), inf, jnp.float32)                     # d = 1

    def diag_step(carry, inp):
        prev2, prev1 = carry
        xcol, d = inp                                            # xcol: [n]
        c0 = prev2[:-1]          # cost[i-1][j-1]
        c1 = prev1[:-1]          # cost[i-1][j]
        c2 = prev1[1:]           # cost[i][j-1]
        take0 = (c0 < c1) & (c0 < c2)
        take1 = (c1 < c0) & (c1 < c2)
        t = jnp.where(take0, 0, jnp.where(take1, 1, 2)).astype(jnp.int32)
        c = jnp.where(take0, c0, jnp.where(take1, c1, c2))
        j = d - i_idx[1:]
        valid = (j >= 1) & (j <= m)
        new = jnp.concatenate(
            [jnp.full((1,), inf, jnp.float32), jnp.where(valid, xcol + c, inf)])
        return (prev1, new), t

    _, tdiag = jax.lax.scan(
        diag_step, (diag0, diag1),
        (xs.T, jnp.arange(2, n + m + 1, dtype=jnp.int32)))       # [ncols, n]
    trace_skew = tdiag.T                                         # [n, ncols]
    # trace_skew[i-1, i+j-2] == trace[i][j] for 1 <= i <= n, 1 <= j <= m.

    def bt_step(_, carry):
        i, j, jt = carry
        active = (i > 0) | (j > 0)
        row = jnp.maximum(i - 1, 0)
        val = (j - 1).astype(jnp.float32) / TOKENS_PER_SECOND
        jt = jt.at[row].set(jnp.where(active & (i > 0), val, jt[row]))
        t = jnp.where(i == 0, 2,
                      jnp.where(j == 0, 1,
                                trace_skew[row, jnp.maximum(i + j - 2, 0)]))
        di = jnp.where(t == 2, 0, 1)
        dj = jnp.where(t == 1, 0, 1)
        i = jnp.where(active, i - di, i)
        j = jnp.where(active, j - dj, j)
        return i, j, jt

    jt0 = jnp.full((n,), -1.0, jnp.float32)   # F.pad value (never needed here)
    _, _, jt = jax.lax.fori_loop(
        0, n + m - 1, bt_step, (jnp.int32(n), jnp.int32(m), jt0))
    return jt


# ---------------------------------------------------------------------------
# Wrapper equivalent to WhisperJumpTimes.forward
# ---------------------------------------------------------------------------
def whisper_jump_times(alignment_heads, sot_sequence_length, segment_length, QKs):
    """
    alignment_heads:      host int array [A, 2] of (layer, head) pairs (static).
    sot_sequence_length:  python int (static — determines output shape).
    segment_length:       python int (static — determines output shape).
    QKs:                  list of [B, H, T, F] arrays (per decoder layer).
    Returns [B, T'] float32 jump times, T' = min(T, segment_length // 2) - sot - 1.
    """
    alignment_heads = np.asarray(alignment_heads)
    sot = int(sot_sequence_length)
    seg = int(segment_length)

    B, H, T, F = QKs[0].shape
    # torch.squeeze(weights, dim=2) in index_QKs is a no-op for T > 1.
    assert T > 1, "decoder sequence length must be > 1"
    # Module-literal semantics: weights[:, :, :seg//2] truncates the token axis.
    Tc = min(T, seg // 2)
    Tp = Tc - sot - 1
    assert Tc >= 2 and Tp >= 1 and F >= PAD + 1, (Tc, Tp, F)
    A = int(alignment_heads.shape[0])

    # Token rows DMA'd per block: either the full T or an 8-aligned prefix
    # covering the Tc surviving rows (keeps the BlockSpec sublane dim legal).
    T_blk = T if Tc == T else min(T, ((Tc + 7) // 8) * 8)

    # One input ref per alignment head, sliced straight out of its source QK
    # tensor by the BlockSpec — no XLA-side stack / extra HBM round trip.
    # Source dtype is preserved (fp16/bf16 QKs are DMA'd at half the bytes);
    # the fp32 cast happens inside the kernel.
    operands = []
    in_specs = []
    for l, h in alignment_heads:
        operands.append(QKs[int(l)])
        in_specs.append(
            pl.BlockSpec((1, 1, T_blk, F),
                         lambda b, _h=int(h): (b, _h, 0, 0)))

    out_spec = pl.BlockSpec((1, Tp, F), lambda b: (b, 0, 0))

    # Right-sized VMEM budget: double-buffered inputs/outputs + fp32 temps.
    in_bytes = A * T_blk * F * np.dtype(QKs[0].dtype).itemsize
    out_bytes = Tp * F * 4
    vmem_limit = int(max(16 << 20,
                         min(96 << 20,
                             2 * (in_bytes + out_bytes) + 16 * Tc * F * 4)))

    kernel = functools.partial(_fused_kernel, sot=sot, tc=Tc, num_heads=A)
    matrix = pl.pallas_call(
        kernel,
        out_shape=jax.ShapeDtypeStruct((B, Tp, F), jnp.float32),
        grid=(B,),
        in_specs=in_specs,
        out_specs=out_spec,
        compiler_params=pltpu.CompilerParams(
            # TODO(synk): on v7x use pltpu.CORE_PARALLEL on this batch axis to
            # split independent batch elements across the two TensorCores.
            dimension_semantics=("parallel",),
            vmem_limit_bytes=vmem_limit),
    )(*operands)

    # batch_jump_times: DTW per batch element, vmapped over B. The F.pad(-1)
    # in the reference is a no-op (the path always yields exactly Tp jumps).
    return jax.vmap(_dtw_jump_times)(matrix)


if __name__ == "__main__":
    key = jax.random.PRNGKey(0)
    B, H, T, F = 2, 8, 8, 128         # batch, heads/layer, decoder tokens, frames
    num_decoder_layers = 4
    num_alignment_heads = 6

    layer_keys = jax.random.split(key, num_decoder_layers)
    QKs = [jax.random.normal(k, (B, H, T, F), dtype=jnp.float32) for k in layer_keys]

    # Deterministic (layer, head) alignment pairs.
    alignment_heads = np.array(
        [[0, 1], [1, 3], [2, 5], [3, 0], [1, 7], [2, 2]], dtype=np.int32)
    assert alignment_heads.shape[0] == num_alignment_heads

    sot_sequence_length = 3
    segment_length = 1332             # seg // 2 = 666 >= T  ->  Tc = T = 8

    out = whisper_jump_times(alignment_heads, sot_sequence_length, segment_length, QKs)
    out = jax.block_until_ready(out)

    expected_tp = min(T, segment_length // 2) - sot_sequence_length - 1
    assert out.shape == (B, expected_tp), out.shape
    assert out.dtype == jnp.float32
    assert bool(jnp.all(jnp.isfinite(out)))
    print("KERNEL_OK")
</pallas_src>

<mosaic_0001>
module attributes {stable_mosaic.version = 11 : i64} {
  func.func @_fused_kernel(%arg0: i32, %arg1: memref<1x1x8x128xf32, #tpu.memory_space<vmem>>, %arg2: memref<1x1x8x128xf32, #tpu.memory_space<vmem>>, %arg3: memref<1x1x8x128xf32, #tpu.memory_space<vmem>>, %arg4: memref<1x1x8x128xf32, #tpu.memory_space<vmem>>, %arg5: memref<1x1x8x128xf32, #tpu.memory_space<vmem>>, %arg6: memref<1x1x8x128xf32, #tpu.memory_space<vmem>>, %arg7: memref<1x4x128xf32, #tpu.memory_space<vmem>>) attributes {dimension_semantics = [#tpu.dimension_semantics<parallel>], iteration_bounds = array<i64: 2>, scalar_prefetch = 0 : i64, scratch_operands = 0 : i64, tpu.core_type = #tpu.core_type<tc>, window_params = [{transform_indices = @transform_0, window_bounds = array<i64: 1, 1, 8, 128>}, {transform_indices = @transform_1, window_bounds = array<i64: 1, 1, 8, 128>}, {transform_indices = @transform_2, window_bounds = array<i64: 1, 1, 8, 128>}, {transform_indices = @transform_3, window_bounds = array<i64: 1, 1, 8, 128>}, {transform_indices = @transform_4, window_bounds = array<i64: 1, 1, 8, 128>}, {transform_indices = @transform_5, window_bounds = array<i64: 1, 1, 8, 128>}, {transform_indices = @transform_6, window_bounds = array<i64: 1, 4, 128>}]} {
    %0 = tpu.iota {dimensions = array<i32: 1>} : vector<1x128xi32>
    %c0_i32 = arith.constant 0 : i32
    %1 = vector.broadcast %c0_i32 : i32 to vector<1x128xi32>
    %2 = arith.cmpi eq, %0, %1 : vector<1x128xi32>
    %c1_i32 = arith.constant 1 : i32
    %3 = vector.broadcast %c1_i32 : i32 to vector<1x128xi32>
    %4 = arith.cmpi eq, %0, %3 : vector<1x128xi32>
    %c2_i32 = arith.constant 2 : i32
    %5 = vector.broadcast %c2_i32 : i32 to vector<1x128xi32>
    %6 = arith.cmpi eq, %0, %5 : vector<1x128xi32>
    %c127_i32 = arith.constant 127 : i32
    %7 = vector.broadcast %c127_i32 : i32 to vector<1x128xi32>
    %8 = arith.cmpi eq, %0, %7 : vector<1x128xi32>
    %c126_i32 = arith.constant 126 : i32
    %9 = vector.broadcast %c126_i32 : i32 to vector<1x128xi32>
    %10 = arith.cmpi eq, %0, %9 : vector<1x128xi32>
    %c125_i32 = arith.constant 125 : i32
    %11 = vector.broadcast %c125_i32 : i32 to vector<1x128xi32>
    %12 = arith.cmpi eq, %0, %11 : vector<1x128xi32>
    %c0 = arith.constant 0 : index
    %c0_0 = arith.constant 0 : index
    %c0_1 = arith.constant 0 : index
    %c0_2 = arith.constant 0 : index
    %13 = vector.load %arg1[%c0, %c0_0, %c0_1, %c0_2] : memref<1x1x8x128xf32, #tpu.memory_space<vmem>>, vector<1x1x8x128xf32>
    %14 = vector.shape_cast %13 : vector<1x1x8x128xf32> to vector<8x128xf32>
    %cst = arith.constant dense<0xFF800000> : vector<8xf32>
    %15 = vector.multi_reduction <maximumf>, %14, %cst [1] : vector<8x128xf32> to vector<8xf32>
    %16 = vector.shape_cast %15 : vector<8xf32> to vector<8x1xf32>
    %17 = vector.broadcast %16 : vector<8x1xf32> to vector<8x128xf32>
    %18 = arith.subf %14, %17 : vector<8x128xf32>
    %19 = math.exp %18 : vector<8x128xf32>
    %cst_3 = arith.constant dense<0.000000e+00> : vector<8xf32>
    %20 = vector.multi_reduction <add>, %19, %cst_3 [1] : vector<8x128xf32> to vector<8xf32>
    %21 = vector.shape_cast %20 : vector<8xf32> to vector<8x1xf32>
    %cst_4 = arith.constant 1.000000e+00 : f32
    %22 = vector.broadcast %cst_4 : f32 to vector<8x1xf32>
    %23 = arith.divf %22, %21 : vector<8x1xf32>
    %24 = vector.broadcast %23 : vector<8x1xf32> to vector<8x128xf32>
    %25 = arith.mulf %19, %24 : vector<8x128xf32>
    %cst_5 = arith.constant dense<0.000000e+00> : vector<128xf32>
    %26 = vector.multi_reduction <add>, %25, %cst_5 [0] : vector<8x128xf32> to vector<128xf32>
    %27 = vector.shape_cast %26 : vector<128xf32> to vector<1x128xf32>
    %cst_6 = arith.constant 8.000000e+00 : f32
    %28 = vector.broadcast %cst_6 : f32 to vector<1x128xf32>
    %29 = arith.divf %27, %28 : vector<1x128xf32>
    %30 = vector.broadcast %29 : vector<1x128xf32> to vector<8x128xf32>
    %31 = arith.subf %25, %30 : vector<8x128xf32>
    %32 = arith.mulf %31, %31 : vector<8x128xf32>
    %cst_7 = arith.constant dense<0.000000e+00> : vector<128xf32>
    %33 = vector.multi_reduction <add>, %32, %cst_7 [0] : vector<8x128xf32> to vector<128xf32>
    %34 = vector.shape_cast %33 : vector<128xf32> to vector<1x128xf32>
    %cst_8 = arith.constant 8.000000e+00 : f32
    %35 = vector.broadcast %cst_8 : f32 to vector<1x128xf32>
    %36 = arith.divf %34, %35 : vector<1x128xf32>
    %37 = math.rsqrt %36 : vector<1x128xf32>
    %38 = vector.broadcast %37 : vector<1x128xf32> to vector<8x128xf32>
    %39 = arith.mulf %31, %38 : vector<8x128xf32>
    %c3_i32 = arith.constant 3 : i32
    %40 = tpu.dynamic_rotate %39 by %c3_i32 dim 1 : vector<8x128xf32>, i32 -> vector<8x128xf32>
    %c2_i32_9 = arith.constant 2 : i32
    %41 = tpu.dynamic_rotate %39 by %c2_i32_9 dim 1 : vector<8x128xf32>, i32 -> vector<8x128xf32>
    %c1_i32_10 = arith.constant 1 : i32
    %42 = tpu.dynamic_rotate %39 by %c1_i32_10 dim 1 : vector<8x128xf32>, i32 -> vector<8x128xf32>
    %c127_i32_11 = arith.constant 127 : i32
    %43 = tpu.dynamic_rotate %39 by %c127_i32_11 dim 1 : vector<8x128xf32>, i32 -> vector<8x128xf32>
    %c126_i32_12 = arith.constant 126 : i32
    %44 = tpu.dynamic_rotate %39 by %c126_i32_12 dim 1 : vector<8x128xf32>, i32 -> vector<8x128xf32>
    %c125_i32_13 = arith.constant 125 : i32
    %45 = tpu.dynamic_rotate %39 by %c125_i32_13 dim 1 : vector<8x128xf32>, i32 -> vector<8x128xf32>
    %46 = vector.shape_cast %2 : vector<1x128xi1> to vector<1x128xi1>
    %47 = vector.broadcast %46 : vector<1x128xi1> to vector<8x128xi1>
    %48 = arith.select %47, %45, %40 : vector<8x128xi1>, vector<8x128xf32>
    %49 = vector.shape_cast %4 : vector<1x128xi1> to vector<1x128xi1>
    %50 = vector.broadcast %49 : vector<1x128xi1> to vector<8x128xi1>
    %51 = arith.select %50, %43, %48 : vector<8x128xi1>, vector<8x128xf32>
    %52 = vector.shape_cast %6 : vector<1x128xi1> to vector<1x128xi1>
    %53 = vector.broadcast %52 : vector<1x128xi1> to vector<8x128xi1>
    %54 = arith.select %53, %42, %51 : vector<8x128xi1>, vector<8x128xf32>
    %55 = vector.shape_cast %2 : vector<1x128xi1> to vector<1x128xi1>
    %56 = vector.broadcast %55 : vector<1x128xi1> to vector<8x128xi1>
    %57 = arith.select %56, %44, %41 : vector<8x128xi1>, vector<8x128xf32>
    %58 = vector.shape_cast %4 : vector<1x128xi1> to vector<1x128xi1>
    %59 = vector.broadcast %58 : vector<1x128xi1> to vector<8x128xi1>
    %60 = arith.select %59, %39, %57 : vector<8x128xi1>, vector<8x128xf32>
    %61 = vector.shape_cast %2 : vector<1x128xi1> to vector<1x128xi1>
    %62 = vector.broadcast %61 : vector<1x128xi1> to vector<8x128xi1>
    %63 = arith.select %62, %43, %42 : vector<8x128xi1>, vector<8x128xf32>
    %64 = vector.shape_cast %8 : vector<1x128xi1> to vector<1x128xi1>
    %65 = vector.broadcast %64 : vector<1x128xi1> to vector<8x128xi1>
    %66 = arith.select %65, %42, %43 : vector<8x128xi1>, vector<8x128xf32>
    %67 = vector.shape_cast %8 : vector<1x128xi1> to vector<1x128xi1>
    %68 = vector.broadcast %67 : vector<1x128xi1> to vector<8x128xi1>
    %69 = arith.select %68, %41, %44 : vector<8x128xi1>, vector<8x128xf32>
    %70 = vector.shape_cast %10 : vector<1x128xi1> to vector<1x128xi1>
    %71 = vector.broadcast %70 : vector<1x128xi1> to vector<8x128xi1>
    %72 = arith.select %71, %39, %69 : vector<8x128xi1>, vector<8x128xf32>
    %73 = vector.shape_cast %8 : vector<1x128xi1> to vector<1x128xi1>
    %74 = vector.broadcast %73 : vector<1x128xi1> to vector<8x128xi1>
    %75 = arith.select %74, %40, %45 : vector<8x128xi1>, vector<8x128xf32>
    %76 = vector.shape_cast %10 : vector<1x128xi1> to vector<1x128xi1>
    %77 = vector.broadcast %76 : vector<1x128xi1> to vector<8x128xi1>
    %78 = arith.select %77, %42, %75 : vector<8x128xi1>, vector<8x128xf32>
    %79 = vector.shape_cast %12 : vector<1x128xi1> to vector<1x128xi1>
    %80 = vector.broadcast %79 : vector<1x128xi1> to vector<8x128xi1>
    %81 = arith.select %80, %43, %78 : vector<8x128xi1>, vector<8x128xf32>
    %82 = arith.minimumf %54, %72 : vector<8x128xf32>
    %83 = arith.maximumf %54, %72 : vector<8x128xf32>
    %84 = arith.minimumf %82, %39 : vector<8x128xf32>
    %85 = arith.maximumf %82, %39 : vector<8x128xf32>
    %86 = arith.minimumf %60, %81 : vector<8x128xf32>
    %87 = arith.maximumf %60, %81 : vector<8x128xf32>
    %88 = arith.minimumf %63, %66 : vector<8x128xf32>
    %89 = arith.maximumf %63, %66 : vector<8x128xf32>
    %90 = arith.maximumf %84, %86 : vector<8x128xf32>
    %91 = arith.minimumf %85, %83 : vector<8x128xf32>
    %92 = arith.maximumf %85, %83 : vector<8x128xf32>
    %93 = arith.minimumf %88, %87 : vector<8x128xf32>
    %94 = arith.maximumf %88, %87 : vector<8x128xf32>
    %95 = arith.maximumf %93, %91 : vector<8x128xf32>
    %96 = arith.minimumf %95, %94 : vector<8x128xf32>
    %97 = arith.minimumf %89, %92 : vector<8x128xf32>
    %98 = arith.minimumf %90, %97 : vector<8x128xf32>
    %99 = arith.maximumf %90, %97 : vector<8x128xf32>
    %100 = arith.maximumf %98, %96 : vector<8x128xf32>
    %101 = arith.minimumf %100, %99 : vector<8x128xf32>
    %c0_14 = arith.constant 0 : index
    %c0_15 = arith.constant 0 : index
    %c0_16 = arith.constant 0 : index
    %c0_17 = arith.constant 0 : index
    %102 = vector.load %arg2[%c0_14, %c0_15, %c0_16, %c0_17] : memref<1x1x8x128xf32, #tpu.memory_space<vmem>>, vector<1x1x8x128xf32>
    %103 = vector.shape_cast %102 : vector<1x1x8x128xf32> to vector<8x128xf32>
    %cst_18 = arith.constant dense<0xFF800000> : vector<8xf32>
    %104 = vector.multi_reduction <maximumf>, %103, %cst_18 [1] : vector<8x128xf32> to vector<8xf32>
    %105 = vector.shape_cast %104 : vector<8xf32> to vector<8x1xf32>
    %106 = vector.broadcast %105 : vector<8x1xf32> to vector<8x128xf32>
    %107 = arith.subf %103, %106 : vector<8x128xf32>
    %108 = math.exp %107 : vector<8x128xf32>
    %cst_19 = arith.constant dense<0.000000e+00> : vector<8xf32>
    %109 = vector.multi_reduction <add>, %108, %cst_19 [1] : vector<8x128xf32> to vector<8xf32>
    %110 = vector.shape_cast %109 : vector<8xf32> to vector<8x1xf32>
    %cst_20 = arith.constant 1.000000e+00 : f32
    %111 = vector.broadcast %cst_20 : f32 to vector<8x1xf32>
    %112 = arith.divf %111, %110 : vector<8x1xf32>
    %113 = vector.broadcast %112 : vector<8x1xf32> to vector<8x128xf32>
    %114 = arith.mulf %108, %113 : vector<8x128xf32>
    %cst_21 = arith.constant dense<0.000000e+00> : vector<128xf32>
    %115 = vector.multi_reduction <add>, %114, %cst_21 [0] : vector<8x128xf32> to vector<128xf32>
    %116 = vector.shape_cast %115 : vector<128xf32> to vector<1x128xf32>
    %cst_22 = arith.constant 8.000000e+00 : f32
    %117 = vector.broadcast %cst_22 : f32 to vector<1x128xf32>
    %118 = arith.divf %116, %117 : vector<1x128xf32>
    %119 = vector.broadcast %118 : vector<1x128xf32> to vector<8x128xf32>
    %120 = arith.subf %114, %119 : vector<8x128xf32>
    %121 = arith.mulf %120, %120 : vector<8x128xf32>
    %cst_23 = arith.constant dense<0.000000e+00> : vector<128xf32>
    %122 = vector.multi_reduction <add>, %121, %cst_23 [0] : vector<8x128xf32> to vector<128xf32>
    %123 = vector.shape_cast %122 : vector<128xf32> to vector<1x128xf32>
    %cst_24 = arith.constant 8.000000e+00 : f32
    %124 = vector.broadcast %cst_24 : f32 to vector<1x128xf32>
    %125 = arith.divf %123, %124 : vector<1x128xf32>
    %126 = math.rsqrt %125 : vector<1x128xf32>
    %127 = vector.broadcast %126 : vector<1x128xf32> to vector<8x128xf32>
    %128 = arith.mulf %120, %127 : vector<8x128xf32>
    %c3_i32_25 = arith.constant 3 : i32
    %129 = tpu.dynamic_rotate %128 by %c3_i32_25 dim 1 : vector<8x128xf32>, i32 -> vector<8x128xf32>
    %c2_i32_26 = arith.constant 2 : i32
    %130 = tpu.dynamic_rotate %128 by %c2_i32_26 dim 1 : vector<8x128xf32>, i32 -> vector<8x128xf32>
    %c1_i32_27 = arith.constant 1 : i32
    %131 = tpu.dynamic_rotate %128 by %c1_i32_27 dim 1 : vector<8x128xf32>, i32 -> vector<8x128xf32>
    %c127_i32_28 = arith.constant 127 : i32
    %132 = tpu.dynamic_rotate %128 by %c127_i32_28 dim 1 : vector<8x128xf32>, i32 -> vector<8x128xf32>
    %c126_i32_29 = arith.constant 126 : i32
    %133 = tpu.dynamic_rotate %128 by %c126_i32_29 dim 1 : vector<8x128xf32>, i32 -> vector<8x128xf32>
    %c125_i32_30 = arith.constant 125 : i32
    %134 = tpu.dynamic_rotate %128 by %c125_i32_30 dim 1 : vector<8x128xf32>, i32 -> vector<8x128xf32>
    %135 = vector.shape_cast %2 : vector<1x128xi1> to vector<1x128xi1>
    %136 = vector.broadcast %135 : vector<1x128xi1> to vector<8x128xi1>
    %137 = arith.select %136, %134, %129 : vector<8x128xi1>, vector<8x128xf32>
    %138 = vector.shape_cast %4 : vector<1x128xi1> to vector<1x128xi1>
    %139 = vector.broadcast %138 : vector<1x128xi1> to vector<8x128xi1>
    %140 = arith.select %139, %132, %137 : vector<8x128xi1>, vector<8x128xf32>
    %141 = vector.shape_cast %6 : vector<1x128xi1> to vector<1x128xi1>
    %142 = vector.broadcast %141 : vector<1x128xi1> to vector<8x128xi1>
    %143 = arith.select %142, %131, %140 : vector<8x128xi1>, vector<8x128xf32>
    %144 = vector.shape_cast %2 : vector<1x128xi1> to vector<1x128xi1>
    %145 = vector.broadcast %144 : vector<1x128xi1> to vector<8x128xi1>
    %146 = arith.select %145, %133, %130 : vector<8x128xi1>, vector<8x128xf32>
    %147 = vector.shape_cast %4 : vector<1x128xi1> to vector<1x128xi1>
    %148 = vector.broadcast %147 : vector<1x128xi1> to vector<8x128xi1>
    %149 = arith.select %148, %128, %146 : vector<8x128xi1>, vector<8x128xf32>
    %150 = vector.shape_cast %2 : vector<1x128xi1> to vector<1x128xi1>
    %151 = vector.broadcast %150 : vector<1x128xi1> to vector<8x128xi1>
    %152 = arith.select %151, %132, %131 : vector<8x128xi1>, vector<8x128xf32>
    %153 = vector.shape_cast %8 : vector<1x128xi1> to vector<1x128xi1>
    %154 = vector.broadcast %153 : vector<1x128xi1> to vector<8x128xi1>
    %155 = arith.select %154, %131, %132 : vector<8x128xi1>, vector<8x128xf32>
    %156 = vector.shape_cast %8 : vector<1x128xi1> to vector<1x128xi1>
    %157 = vector.broadcast %156 : vector<1x128xi1> to vector<8x128xi1>
    %158 = arith.select %157, %130, %133 : vector<8x128xi1>, vector<8x128xf32>
    %159 = vector.shape_cast %10 : vector<1x128xi1> to vector<1x128xi1>
    %160 = vector.broadcast %159 : vector<1x128xi1> to vector<8x128xi1>
    %161 = arith.select %160, %128, %158 : vector<8x128xi1>, vector<8x128xf32>
    %162 = vector.shape_cast %8 : vector<1x128xi1> to vector<1x128xi1>
    %163 = vector.broadcast %162 : vector<1x128xi1> to vector<8x128xi1>
    %164 = arith.select %163, %129, %134 : vector<8x128xi1>, vector<8x128xf32>
    %165 = vector.shape_cast %10 : vector<1x128xi1> to vector<1x128xi1>
    %166 = vector.broadcast %165 : vector<1x128xi1> to vector<8x128xi1>
    %167 = arith.select %166, %131, %164 : vector<8x128xi1>, vector<8x128xf32>
    %168 = vector.shape_cast %12 : vector<1x128xi1> to vector<1x128xi1>
    %169 = vector.broadcast %168 : vector<1x128xi1> to vector<8x128xi1>
    %170 = arith.select %169, %132, %167 : vector<8x128xi1>, vector<8x128xf32>
    %171 = arith.minimumf %143, %161 : vector<8x128xf32>
    %172 = arith.maximumf %143, %161 : vector<8x128xf32>
    %173 = arith.minimumf %171, %128 : vector<8x128xf32>
    %174 = arith.maximumf %171, %128 : vector<8x128xf32>
    %175 = arith.minimumf %149, %170 : vector<8x128xf32>
    %176 = arith.maximumf %149, %170 : vector<8x128xf32>
    %177 = arith.minimumf %152, %155 : vector<8x128xf32>
    %178 = arith.maximumf %152, %155 : vector<8x128xf32>
    %179 = arith.maximumf %173, %175 : vector<8x128xf32>
    %180 = arith.minimumf %174, %172 : vector<8x128xf32>
    %181 = arith.maximumf %174, %172 : vector<8x128xf32>
    %182 = arith.minimumf %177, %176 : vector<8x128xf32>
    %183 = arith.maximumf %177, %176 : vector<8x128xf32>
    %184 = arith.maximumf %182, %180 : vector<8x128xf32>
    %185 = arith.minimumf %184, %183 : vector<8x128xf32>
    %186 = arith.minimumf %178, %181 : vector<8x128xf32>
    %187 = arith.minimumf %179, %186 : vector<8x128xf32>
    %188 = arith.maximumf %179, %186 : vector<8x128xf32>
    %189 = arith.maximumf %187, %185 : vector<8x128xf32>
    %190 = arith.minimumf %189, %188 : vector<8x128xf32>
    %191 = arith.addf %101, %190 : vector<8x128xf32>
    %c0_31 = arith.constant 0 : index
    %c0_32 = arith.constant 0 : index
    %c0_33 = arith.constant 0 : index
    %c0_34 = arith.constant 0 : index
    %192 = vector.load %arg3[%c0_31, %c0_32, %c0_33, %c0_34] : memref<1x1x8x128xf32, #tpu.memory_space<vmem>>, vector<1x1x8x128xf32>
    %193 = vector.shape_cast %192 : vector<1x1x8x128xf32> to vector<8x128xf32>
    %cst_35 = arith.constant dense<0xFF800000> : vector<8xf32>
    %194 = vector.multi_reduction <maximumf>, %193, %cst_35 [1] : vector<8x128xf32> to vector<8xf32>
    %195 = vector.shape_cast %194 : vector<8xf32> to vector<8x1xf32>
    %196 = vector.broadcast %195 : vector<8x1xf32> to vector<8x128xf32>
    %197 = arith.subf %193, %196 : vector<8x128xf32>
    %198 = math.exp %197 : vector<8x128xf32>
    %cst_36 = arith.constant dense<0.000000e+00> : vector<8xf32>
    %199 = vector.multi_reduction <add>, %198, %cst_36 [1] : vector<8x128xf32> to vector<8xf32>
    %200 = vector.shape_cast %199 : vector<8xf32> to vector<8x1xf32>
    %cst_37 = arith.constant 1.000000e+00 : f32
    %201 = vector.broadcast %cst_37 : f32 to vector<8x1xf32>
    %202 = arith.divf %201, %200 : vector<8x1xf32>
    %203 = vector.broadcast %202 : vector<8x1xf32> to vector<8x128xf32>
    %204 = arith.mulf %198, %203 : vector<8x128xf32>
    %cst_38 = arith.constant dense<0.000000e+00> : vector<128xf32>
    %205 = vector.multi_reduction <add>, %204, %cst_38 [0] : vector<8x128xf32> to vector<128xf32>
    %206 = vector.shape_cast %205 : vector<128xf32> to vector<1x128xf32>
    %cst_39 = arith.constant 8.000000e+00 : f32
    %207 = vector.broadcast %cst_39 : f32 to vector<1x128xf32>
    %208 = arith.divf %206, %207 : vector<1x128xf32>
    %209 = vector.broadcast %208 : vector<1x128xf32> to vector<8x128xf32>
    %210 = arith.subf %204, %209 : vector<8x128xf32>
    %211 = arith.mulf %210, %210 : vector<8x128xf32>
    %cst_40 = arith.constant dense<0.000000e+00> : vector<128xf32>
    %212 = vector.multi_reduction <add>, %211, %cst_40 [0] : vector<8x128xf32> to vector<128xf32>
    %213 = vector.shape_cast %212 : vector<128xf32> to vector<1x128xf32>
    %cst_41 = arith.constant 8.000000e+00 : f32
    %214 = vector.broadcast %cst_41 : f32 to vector<1x128xf32>
    %215 = arith.divf %213, %214 : vector<1x128xf32>
    %216 = math.rsqrt %215 : vector<1x128xf32>
    %217 = vector.broadcast %216 : vector<1x128xf32> to vector<8x128xf32>
    %218 = arith.mulf %210, %217 : vector<8x128xf32>
    %c3_i32_42 = arith.constant 3 : i32
    %219 = tpu.dynamic_rotate %218 by %c3_i32_42 dim 1 : vector<8x128xf32>, i32 -> vector<8x128xf32>
    %c2_i32_43 = arith.constant 2 : i32
    %220 = tpu.dynamic_rotate %218 by %c2_i32_43 dim 1 : vector<8x128xf32>, i32 -> vector<8x128xf32>
    %c1_i32_44 = arith.constant 1 : i32
    %221 = tpu.dynamic_rotate %218 by %c1_i32_44 dim 1 : vector<8x128xf32>, i32 -> vector<8x128xf32>
    %c127_i32_45 = arith.constant 127 : i32
    %222 = tpu.dynamic_rotate %218 by %c127_i32_45 dim 1 : vector<8x128xf32>, i32 -> vector<8x128xf32>
    %c126_i32_46 = arith.constant 126 : i32
    %223 = tpu.dynamic_rotate %218 by %c126_i32_46 dim 1 : vector<8x128xf32>, i32 -> vector<8x128xf32>
    %c125_i32_47 = arith.constant 125 : i32
    %224 = tpu.dynamic_rotate %218 by %c125_i32_47 dim 1 : vector<8x128xf32>, i32 -> vector<8x128xf32>
    %225 = vector.shape_cast %2 : vector<1x128xi1> to vector<1x128xi1>
    %226 = vector.broadcast %225 : vector<1x128xi1> to vector<8x128xi1>
    %227 = arith.select %226, %224, %219 : vector<8x128xi1>, vector<8x128xf32>
    %228 = vector.shape_cast %4 : vector<1x128xi1> to vector<1x128xi1>
    %229 = vector.broadcast %228 : vector<1x128xi1> to vector<8x128xi1>
    %230 = arith.select %229, %222, %227 : vector<8x128xi1>, vector<8x128xf32>
    %231 = vector.shape_cast %6 : vector<1x128xi1> to vector<1x128xi1>
    %232 = vector.broadcast %231 : vector<1x128xi1> to vector<8x128xi1>
    %233 = arith.select %232, %221, %230 : vector<8x128xi1>, vector<8x128xf32>
    %234 = vector.shape_cast %2 : vector<1x128xi1> to vector<1x128xi1>
    %235 = vector.broadcast %234 : vector<1x128xi1> to vector<8x128xi1>
    %236 = arith.select %235, %223, %220 : vector<8x128xi1>, vector<8x128xf32>
    %237 = vector.shape_cast %4 : vector<1x128xi1> to vector<1x128xi1>
    %238 = vector.broadcast %237 : vector<1x128xi1> to vector<8x128xi1>
    %239 = arith.select %238, %218, %236 : vector<8x128xi1>, vector<8x128xf32>
    %240 = vector.shape_cast %2 : vector<1x128xi1> to vector<1x128xi1>
    %241 = vector.broadcast %240 : vector<1x128xi1> to vector<8x128xi1>
    %242 = arith.select %241, %222, %221 : vector<8x128xi1>, vector<8x128xf32>
    %243 = vector.shape_cast %8 : vector<1x128xi1> to vector<1x128xi1>
    %244 = vector.broadcast %243 : vector<1x128xi1> to vector<8x128xi1>
    %245 = arith.select %244, %221, %222 : vector<8x128xi1>, vector<8x128xf32>
    %246 = vector.shape_cast %8 : vector<1x128xi1> to vector<1x128xi1>
    %247 = vector.broadcast %246 : vector<1x128xi1> to vector<8x128xi1>
    %248 = arith.select %247, %220, %223 : vector<8x128xi1>, vector<8x128xf32>
    %249 = vector.shape_cast %10 : vector<1x128xi1> to vector<1x128xi1>
    %250 = vector.broadcast %249 : vector<1x128xi1> to vector<8x128xi1>
    %251 = arith.select %250, %218, %248 : vector<8x128xi1>, vector<8x128xf32>
    %252 = vector.shape_cast %8 : vector<1x128xi1> to vector<1x128xi1>
    %253 = vector.broadcast %252 : vector<1x128xi1> to vector<8x128xi1>
    %254 = arith.select %253, %219, %224 : vector<8x128xi1>, vector<8x128xf32>
    %255 = vector.shape_cast %10 : vector<1x128xi1> to vector<1x128xi1>
    %256 = vector.broadcast %255 : vector<1x128xi1> to vector<8x128xi1>
    %257 = arith.select %256, %221, %254 : vector<8x128xi1>, vector<8x128xf32>
    %258 = vector.shape_cast %12 : vector<1x128xi1> to vector<1x128xi1>
    %259 = vector.broadcast %258 : vector<1x128xi1> to vector<8x128xi1>
    %260 = arith.select %259, %222, %257 : vector<8x128xi1>, vector<8x128xf32>
    %261 = arith.minimumf %233, %251 : vector<8x128xf32>
    %262 = arith.maximumf %233, %251 : vector<8x128xf32>
    %263 = arith.minimumf %261, %218 : vector<8x128xf32>
    %264 = arith.maximumf %261, %218 : vector<8x128xf32>
    %265 = arith.minimumf %239, %260 : vector<8x128xf32>
    %266 = arith.maximumf %239, %260 : vector<8x128xf32>
    %267 = arith.minimumf %242, %245 : vector<8x128xf32>
    %268 = arith.maximumf %242, %245 : vector<8x128xf32>
    %269 = arith.maximumf %263, %265 : vector<8x128xf32>
    %270 = arith.minimumf %264, %262 : vector<8x128xf32>
    %271 = arith.maximumf %264, %262 : vector<8x128xf32>
    %272 = arith.minimumf %267, %266 : vector<8x128xf32>
    %273 = arith.maximumf %267, %266 : vector<8x128xf32>
    %274 = arith.maximumf %272, %270 : vector<8x128xf32>
    %275 = arith.minimumf %274, %273 : vector<8x128xf32>
    %276 = arith.minimumf %268, %271 : vector<8x128xf32>
    %277 = arith.minimumf %269, %276 : vector<8x128xf32>
    %278 = arith.maximumf %269, %276 : vector<8x128xf32>
    %279 = arith.maximumf %277, %275 : vector<8x128xf32>
    %280 = arith.minimumf %279, %278 : vector<8x128xf32>
    %281 = arith.addf %191, %280 : vector<8x128xf32>
    %c0_48 = arith.constant 0 : index
    %c0_49 = arith.constant 0 : index
    %c0_50 = arith.constant 0 : index
    %c0_51 = arith.constant 0 : index
    %282 = vector.load %arg4[%c0_48, %c0_49, %c0_50, %c0_51] : memref<1x1x8x128xf32, #tpu.memory_space<vmem>>, vector<1x1x8x128xf32>
    %283 = vector.shape_cast %282 : vector<1x1x8x128xf32> to vector<8x128xf32>
    %cst_52 = arith.constant dense<0xFF800000> : vector<8xf32>
    %284 = vector.multi_reduction <maximumf>, %283, %cst_52 [1] : vector<8x128xf32> to vector<8xf32>
    %285 = vector.shape_cast %284 : vector<8xf32> to vector<8x1xf32>
    %286 = vector.broadcast %285 : vector<8x1xf32> to vector<8x128xf32>
    %287 = arith.subf %283, %286 : vector<8x128xf32>
    %288 = math.exp %287 : vector<8x128xf32>
    %cst_53 = arith.constant dense<0.000000e+00> : vector<8xf32>
    %289 = vector.multi_reduction <add>, %288, %cst_53 [1] : vector<8x128xf32> to vector<8xf32>
    %290 = vector.shape_cast %289 : vector<8xf32> to vector<8x1xf32>
    %cst_54 = arith.constant 1.000000e+00 : f32
    %291 = vector.broadcast %cst_54 : f32 to vector<8x1xf32>
    %292 = arith.divf %291, %290 : vector<8x1xf32>
    %293 = vector.broadcast %292 : vector<8x1xf32> to vector<8x128xf32>
    %294 = arith.mulf %288, %293 : vector<8x128xf32>
    %cst_55 = arith.constant dense<0.000000e+00> : vector<128xf32>
    %295 = vector.multi_reduction <add>, %294, %cst_55 [0] : vector<8x128xf32> to vector<128xf32>
    %296 = vector.shape_cast %295 : vector<128xf32> to vector<1x128xf32>
    %cst_56 = arith.constant 8.000000e+00 : f32
    %297 = vector.broadcast %cst_56 : f32 to vector<1x128xf32>
    %298 = arith.divf %296, %297 : vector<1x128xf32>
    %299 = vector.broadcast %298 : vector<1x128xf32> to vector<8x128xf32>
    %300 = arith.subf %294, %299 : vector<8x128xf32>
    %301 = arith.mulf %300, %300 : vector<8x128xf32>
    %cst_57 = arith.constant dense<0.000000e+00> : vector<128xf32>
    %302 = vector.multi_reduction <add>, %301, %cst_57 [0] : vector<8x128xf32> to vector<128xf32>
    %303 = vector.shape_cast %302 : vector<128xf32> to vector<1x128xf32>
    %cst_58 = arith.constant 8.000000e+00 : f32
    %304 = vector.broadcast %cst_58 : f32 to vector<1x128xf32>
    %305 = arith.divf %303, %304 : vector<1x128xf32>
    %306 = math.rsqrt %305 : vector<1x128xf32>
    %307 = vector.broadcast %306 : vector<1x128xf32> to vector<8x128xf32>
    %308 = arith.mulf %300, %307 : vector<8x128xf32>
    %c3_i32_59 = arith.constant 3 : i32
    %309 = tpu.dynamic_rotate %308 by %c3_i32_59 dim 1 : vector<8x128xf32>, i32 -> vector<8x128xf32>
    %c2_i32_60 = arith.constant 2 : i32
    %310 = tpu.dynamic_rotate %308 by %c2_i32_60 dim 1 : vector<8x128xf32>, i32 -> vector<8x128xf32>
    %c1_i32_61 = arith.constant 1 : i32
    %311 = tpu.dynamic_rotate %308 by %c1_i32_61 dim 1 : vector<8x128xf32>, i32 -> vector<8x128xf32>
    %c127_i32_62 = arith.constant 127 : i32
    %312 = tpu.dynamic_rotate %308 by %c127_i32_62 dim 1 : vector<8x128xf32>, i32 -> vector<8x128xf32>
    %c126_i32_63 = arith.constant 126 : i32
    %313 = tpu.dynamic_rotate %308 by %c126_i32_63 dim 1 : vector<8x128xf32>, i32 -> vector<8x128xf32>
    %c125_i32_64 = arith.constant 125 : i32
    %314 = tpu.dynamic_rotate %308 by %c125_i32_64 dim 1 : vector<8x128xf32>, i32 -> vector<8x128xf32>
    %315 = vector.shape_cast %2 : vector<1x128xi1> to vector<1x128xi1>
    %316 = vector.broadcast %315 : vector<1x128xi1> to vector<8x128xi1>
    %317 = arith.select %316, %314, %309 : vector<8x128xi1>, vector<8x128xf32>
    %318 = vector.shape_cast %4 : vector<1x128xi1> to vector<1x128xi1>
    %319 = vector.broadcast %318 : vector<1x128xi1> to vector<8x128xi1>
    %320 = arith.select %319, %312, %317 : vector<8x128xi1>, vector<8x128xf32>
    %321 = vector.shape_cast %6 : vector<1x128xi1> to vector<1x128xi1>
    %322 = vector.broadcast %321 : vector<1x128xi1> to vector<8x128xi1>
    %323 = arith.select %322, %311, %320 : vector<8x128xi1>, vector<8x128xf32>
    %324 = vector.shape_cast %2 : vector<1x128xi1> to vector<1x128xi1>
    %325 = vector.broadcast %324 : vector<1x128xi1> to vector<8x128xi1>
    %326 = arith.select %325, %313, %310 : vector<8x128xi1>, vector<8x128xf32>
    %327 = vector.shape_cast %4 : vector<1x128xi1> to vector<1x128xi1>
    %328 = vector.broadcast %327 : vector<1x128xi1> to vector<8x128xi1>
    %329 = arith.select %328, %308, %326 : vector<8x128xi1>, vector<8x128xf32>
    %330 = vector.shape_cast %2 : vector<1x128xi1> to vector<1x128xi1>
    %331 = vector.broadcast %330 : vector<1x128xi1> to vector<8x128xi1>
    %332 = arith.select %331, %312, %311 : vector<8x128xi1>, vector<8x128xf32>
    %333 = vector.shape_cast %8 : vector<1x128xi1> to vector<1x128xi1>
    %334 = vector.broadcast %333 : vector<1x128xi1> to vector<8x128xi1>
    %335 = arith.select %334, %311, %312 : vector<8x128xi1>, vector<8x128xf32>
    %336 = vector.shape_cast %8 : vector<1x128xi1> to vector<1x128xi1>
    %337 = vector.broadcast %336 : vector<1x128xi1> to vector<8x128xi1>
    %338 = arith.select %337, %310, %313 : vector<8x128xi1>, vector<8x128xf32>
    %339 = vector.shape_cast %10 : vector<1x128xi1> to vector<1x128xi1>
    %340 = vector.broadcast %339 : vector<1x128xi1> to vector<8x128xi1>
    %341 = arith.select %340, %308, %338 : vector<8x128xi1>, vector<8x128xf32>
    %342 = vector.shape_cast %8 : vector<1x128xi1> to vector<1x128xi1>
    %343 = vector.broadcast %342 : vector<1x128xi1> to vector<8x128xi1>
    %344 = arith.select %343, %309, %314 : vector<8x128xi1>, vector<8x128xf32>
    %345 = vector.shape_cast %10 : vector<1x128xi1> to vector<1x128xi1>
    %346 = vector.broadcast %345 : vector<1x128xi1> to vector<8x128xi1>
    %347 = arith.select %346, %311, %344 : vector<8x128xi1>, vector<8x128xf32>
    %348 = vector.shape_cast %12 : vector<1x128xi1> to vector<1x128xi1>
    %349 = vector.broadcast %348 : vector<1x128xi1> to vector<8x128xi1>
    %350 = arith.select %349, %312, %347 : vector<8x128xi1>, vector<8x128xf32>
    %351 = arith.minimumf %323, %341 : vector<8x128xf32>
    %352 = arith.maximumf %323, %341 : vector<8x128xf32>
    %353 = arith.minimumf %351, %308 : vector<8x128xf32>
    %354 = arith.maximumf %351, %308 : vector<8x128xf32>
    %355 = arith.minimumf %329, %350 : vector<8x128xf32>
    %356 = arith.maximumf %329, %350 : vector<8x128xf32>
    %357 = arith.minimumf %332, %335 : vector<8x128xf32>
    %358 = arith.maximumf %332, %335 : vector<8x128xf32>
    %359 = arith.maximumf %353, %355 : vector<8x128xf32>
    %360 = arith.minimumf %354, %352 : vector<8x128xf32>
    %361 = arith.maximumf %354, %352 : vector<8x128xf32>
    %362 = arith.minimumf %357, %356 : vector<8x128xf32>
    %363 = arith.maximumf %357, %356 : vector<8x128xf32>
    %364 = arith.maximumf %362, %360 : vector<8x128xf32>
    %365 = arith.minimumf %364, %363 : vector<8x128xf32>
    %366 = arith.minimumf %358, %361 : vector<8x128xf32>
    %367 = arith.minimumf %359, %366 : vector<8x128xf32>
    %368 = arith.maximumf %359, %366 : vector<8x128xf32>
    %369 = arith.maximumf %367, %365 : vector<8x128xf32>
    %370 = arith.minimumf %369, %368 : vector<8x128xf32>
    %371 = arith.addf %281, %370 : vector<8x128xf32>
    %c0_65 = arith.constant 0 : index
    %c0_66 = arith.constant 0 : index
    %c0_67 = arith.constant 0 : index
    %c0_68 = arith.constant 0 : index
    %372 = vector.load %arg5[%c0_65, %c0_66, %c0_67, %c0_68] : memref<1x1x8x128xf32, #tpu.memory_space<vmem>>, vector<1x1x8x128xf32>
    %373 = vector.shape_cast %372 : vector<1x1x8x128xf32> to vector<8x128xf32>
    %cst_69 = arith.constant dense<0xFF800000> : vector<8xf32>
    %374 = vector.multi_reduction <maximumf>, %373, %cst_69 [1] : vector<8x128xf32> to vector<8xf32>
    %375 = vector.shape_cast %374 : vector<8xf32> to vector<8x1xf32>
    %376 = vector.broadcast %375 : vector<8x1xf32> to vector<8x128xf32>
    %377 = arith.subf %373, %376 : vector<8x128xf32>
    %378 = math.exp %377 : vector<8x128xf32>
    %cst_70 = arith.constant dense<0.000000e+00> : vector<8xf32>
    %379 = vector.multi_reduction <add>, %378, %cst_70 [1] : vector<8x128xf32> to vector<8xf32>
    %380 = vector.shape_cast %379 : vector<8xf32> to vector<8x1xf32>
    %cst_71 = arith.constant 1.000000e+00 : f32
    %381 = vector.broadcast %cst_71 : f32 to vector<8x1xf32>
    %382 = arith.divf %381, %380 : vector<8x1xf32>
    %383 = vector.broadcast %382 : vector<8x1xf32> to vector<8x128xf32>
    %384 = arith.mulf %378, %383 : vector<8x128xf32>
    %cst_72 = arith.constant dense<0.000000e+00> : vector<128xf32>
    %385 = vector.multi_reduction <add>, %384, %cst_72 [0] : vector<8x128xf32> to vector<128xf32>
    %386 = vector.shape_cast %385 : vector<128xf32> to vector<1x128xf32>
    %cst_73 = arith.constant 8.000000e+00 : f32
    %387 = vector.broadcast %cst_73 : f32 to vector<1x128xf32>
    %388 = arith.divf %386, %387 : vector<1x128xf32>
    %389 = vector.broadcast %388 : vector<1x128xf32> to vector<8x128xf32>
    %390 = arith.subf %384, %389 : vector<8x128xf32>
    %391 = arith.mulf %390, %390 : vector<8x128xf32>
    %cst_74 = arith.constant dense<0.000000e+00> : vector<128xf32>
    %392 = vector.multi_reduction <add>, %391, %cst_74 [0] : vector<8x128xf32> to vector<128xf32>
    %393 = vector.shape_cast %392 : vector<128xf32> to vector<1x128xf32>
    %cst_75 = arith.constant 8.000000e+00 : f32
    %394 = vector.broadcast %cst_75 : f32 to vector<1x128xf32>
    %395 = arith.divf %393, %394 : vector<1x128xf32>
    %396 = math.rsqrt %395 : vector<1x128xf32>
    %397 = vector.broadcast %396 : vector<1x128xf32> to vector<8x128xf32>
    %398 = arith.mulf %390, %397 : vector<8x128xf32>
    %c3_i32_76 = arith.constant 3 : i32
    %399 = tpu.dynamic_rotate %398 by %c3_i32_76 dim 1 : vector<8x128xf32>, i32 -> vector<8x128xf32>
    %c2_i32_77 = arith.constant 2 : i32
    %400 = tpu.dynamic_rotate %398 by %c2_i32_77 dim 1 : vector<8x128xf32>, i32 -> vector<8x128xf32>
    %c1_i32_78 = arith.constant 1 : i32
    %401 = tpu.dynamic_rotate %398 by %c1_i32_78 dim 1 : vector<8x128xf32>, i32 -> vector<8x128xf32>
    %c127_i32_79 = arith.constant 127 : i32
    %402 = tpu.dynamic_rotate %398 by %c127_i32_79 dim 1 : vector<8x128xf32>, i32 -> vector<8x128xf32>
    %c126_i32_80 = arith.constant 126 : i32
    %403 = tpu.dynamic_rotate %398 by %c126_i32_80 dim 1 : vector<8x128xf32>, i32 -> vector<8x128xf32>
    %c125_i32_81 = arith.constant 125 : i32
    %404 = tpu.dynamic_rotate %398 by %c125_i32_81 dim 1 : vector<8x128xf32>, i32 -> vector<8x128xf32>
    %405 = vector.shape_cast %2 : vector<1x128xi1> to vector<1x128xi1>
    %406 = vector.broadcast %405 : vector<1x128xi1> to vector<8x128xi1>
    %407 = arith.select %406, %404, %399 : vector<8x128xi1>, vector<8x128xf32>
    %408 = vector.shape_cast %4 : vector<1x128xi1> to vector<1x128xi1>
    %409 = vector.broadcast %408 : vector<1x128xi1> to vector<8x128xi1>
    %410 = arith.select %409, %402, %407 : vector<8x128xi1>, vector<8x128xf32>
    %411 = vector.shape_cast %6 : vector<1x128xi1> to vector<1x128xi1>
    %412 = vector.broadcast %411 : vector<1x128xi1> to vector<8x128xi1>
    %413 = arith.select %412, %401, %410 : vector<8x128xi1>, vector<8x128xf32>
    %414 = vector.shape_cast %2 : vector<1x128xi1> to vector<1x128xi1>
    %415 = vector.broadcast %414 : vector<1x128xi1> to vector<8x128xi1>
    %416 = arith.select %415, %403, %400 : vector<8x128xi1>, vector<8x128xf32>
    %417 = vector.shape_cast %4 : vector<1x128xi1> to vector<1x128xi1>
    %418 = vector.broadcast %417 : vector<1x128xi1> to vector<8x128xi1>
    %419 = arith.select %418, %398, %416 : vector<8x128xi1>, vector<8x128xf32>
    %420 = vector.shape_cast %2 : vector<1x128xi1> to vector<1x128xi1>
    %421 = vector.broadcast %420 : vector<1x128xi1> to vector<8x128xi1>
    %422 = arith.select %421, %402, %401 : vector<8x128xi1>, vector<8x128xf32>
    %423 = vector.shape_cast %8 : vector<1x128xi1> to vector<1x128xi1>
    %424 = vector.broadcast %423 : vector<1x128xi1> to vector<8x128xi1>
    %425 = arith.select %424, %401, %402 : vector<8x128xi1>, vector<8x128xf32>
    %426 = vector.shape_cast %8 : vector<1x128xi1> to vector<1x128xi1>
    %427 = vector.broadcast %426 : vector<1x128xi1> to vector<8x128xi1>
    %428 = arith.select %427, %400, %403 : vector<8x128xi1>, vector<8x128xf32>
    %429 = vector.shape_cast %10 : vector<1x128xi1> to vector<1x128xi1>
    %430 = vector.broadcast %429 : vector<1x128xi1> to vector<8x128xi1>
    %431 = arith.select %430, %398, %428 : vector<8x128xi1>, vector<8x128xf32>
    %432 = vector.shape_cast %8 : vector<1x128xi1> to vector<1x128xi1>
    %433 = vector.broadcast %432 : vector<1x128xi1> to vector<8x128xi1>
    %434 = arith.select %433, %399, %404 : vector<8x128xi1>, vector<8x128xf32>
    %435 = vector.shape_cast %10 : vector<1x128xi1> to vector<1x128xi1>
    %436 = vector.broadcast %435 : vector<1x128xi1> to vector<8x128xi1>
    %437 = arith.select %436, %401, %434 : vector<8x128xi1>, vector<8x128xf32>
    %438 = vector.shape_cast %12 : vector<1x128xi1> to vector<1x128xi1>
    %439 = vector.broadcast %438 : vector<1x128xi1> to vector<8x128xi1>
    %440 = arith.select %439, %402, %437 : vector<8x128xi1>, vector<8x128xf32>
    %441 = arith.minimumf %413, %431 : vector<8x128xf32>
    %442 = arith.maximumf %413, %431 : vector<8x128xf32>
    %443 = arith.minimumf %441, %398 : vector<8x128xf32>
    %444 = arith.maximumf %441, %398 : vector<8x128xf32>
    %445 = arith.minimumf %419, %440 : vector<8x128xf32>
    %446 = arith.maximumf %419, %440 : vector<8x128xf32>
    %447 = arith.minimumf %422, %425 : vector<8x128xf32>
    %448 = arith.maximumf %422, %425 : vector<8x128xf32>
    %449 = arith.maximumf %443, %445 : vector<8x128xf32>
    %450 = arith.minimumf %444, %442 : vector<8x128xf32>
    %451 = arith.maximumf %444, %442 : vector<8x128xf32>
    %452 = arith.minimumf %447, %446 : vector<8x128xf32>
    %453 = arith.maximumf %447, %446 : vector<8x128xf32>
    %454 = arith.maximumf %452, %450 : vector<8x128xf32>
    %455 = arith.minimumf %454, %453 : vector<8x128xf32>
    %456 = arith.minimumf %448, %451 : vector<8x128xf32>
    %457 = arith.minimumf %449, %456 : vector<8x128xf32>
    %458 = arith.maximumf %449, %456 : vector<8x128xf32>
    %459 = arith.maximumf %457, %455 : vector<8x128xf32>
    %460 = arith.minimumf %459, %458 : vector<8x128xf32>
    %461 = arith.addf %371, %460 : vector<8x128xf32>
    %c0_82 = arith.constant 0 : index
    %c0_83 = arith.constant 0 : index
    %c0_84 = arith.constant 0 : index
    %c0_85 = arith.constant 0 : index
    %462 = vector.load %arg6[%c0_82, %c0_83, %c0_84, %c0_85] : memref<1x1x8x128xf32, #tpu.memory_space<vmem>>, vector<1x1x8x128xf32>
    %463 = vector.shape_cast %462 : vector<1x1x8x128xf32> to vector<8x128xf32>
    %cst_86 = arith.constant dense<0xFF800000> : vector<8xf32>
    %464 = vector.multi_reduction <maximumf>, %463, %cst_86 [1] : vector<8x128xf32> to vector<8xf32>
    %465 = vector.shape_cast %464 : vector<8xf32> to vector<8x1xf32>
    %466 = vector.broadcast %465 : vector<8x1xf32> to vector<8x128xf32>
    %467 = arith.subf %463, %466 : vector<8x128xf32>
    %468 = math.exp %467 : vector<8x128xf32>
    %cst_87 = arith.constant dense<0.000000e+00> : vector<8xf32>
    %469 = vector.multi_reduction <add>, %468, %cst_87 [1] : vector<8x128xf32> to vector<8xf32>
    %470 = vector.shape_cast %469 : vector<8xf32> to vector<8x1xf32>
    %cst_88 = arith.constant 1.000000e+00 : f32
    %471 = vector.broadcast %cst_88 : f32 to vector<8x1xf32>
    %472 = arith.divf %471, %470 : vector<8x1xf32>
    %473 = vector.broadcast %472 : vector<8x1xf32> to vector<8x128xf32>
    %474 = arith.mulf %468, %473 : vector<8x128xf32>
    %cst_89 = arith.constant dense<0.000000e+00> : vector<128xf32>
    %475 = vector.multi_reduction <add>, %474, %cst_89 [0] : vector<8x128xf32> to vector<128xf32>
    %476 = vector.shape_cast %475 : vector<128xf32> to vector<1x128xf32>
    %cst_90 = arith.constant 8.000000e+00 : f32
    %477 = vector.broadcast %cst_90 : f32 to vector<1x128xf32>
    %478 = arith.divf %476, %477 : vector<1x128xf32>
    %479 = vector.broadcast %478 : vector<1x128xf32> to vector<8x128xf32>
    %480 = arith.subf %474, %479 : vector<8x128xf32>
    %481 = arith.mulf %480, %480 : vector<8x128xf32>
    %cst_91 = arith.constant dense<0.000000e+00> : vector<128xf32>
    %482 = vector.multi_reduction <add>, %481, %cst_91 [0] : vector<8x128xf32> to vector<128xf32>
    %483 = vector.shape_cast %482 : vector<128xf32> to vector<1x128xf32>
    %cst_92 = arith.constant 8.000000e+00 : f32
    %484 = vector.broadcast %cst_92 : f32 to vector<1x128xf32>
    %485 = arith.divf %483, %484 : vector<1x128xf32>
    %486 = math.rsqrt %485 : vector<1x128xf32>
    %487 = vector.broadcast %486 : vector<1x128xf32> to vector<8x128xf32>
    %488 = arith.mulf %480, %487 : vector<8x128xf32>
    %c3_i32_93 = arith.constant 3 : i32
    %489 = tpu.dynamic_rotate %488 by %c3_i32_93 dim 1 : vector<8x128xf32>, i32 -> vector<8x128xf32>
    %c2_i32_94 = arith.constant 2 : i32
    %490 = tpu.dynamic_rotate %488 by %c2_i32_94 dim 1 : vector<8x128xf32>, i32 -> vector<8x128xf32>
    %c1_i32_95 = arith.constant 1 : i32
    %491 = tpu.dynamic_rotate %488 by %c1_i32_95 dim 1 : vector<8x128xf32>, i32 -> vector<8x128xf32>
    %c127_i32_96 = arith.constant 127 : i32
    %492 = tpu.dynamic_rotate %488 by %c127_i32_96 dim 1 : vector<8x128xf32>, i32 -> vector<8x128xf32>
    %c126_i32_97 = arith.constant 126 : i32
    %493 = tpu.dynamic_rotate %488 by %c126_i32_97 dim 1 : vector<8x128xf32>, i32 -> vector<8x128xf32>
    %c125_i32_98 = arith.constant 125 : i32
    %494 = tpu.dynamic_rotate %488 by %c125_i32_98 dim 1 : vector<8x128xf32>, i32 -> vector<8x128xf32>
    %495 = vector.shape_cast %2 : vector<1x128xi1> to vector<1x128xi1>
    %496 = vector.broadcast %495 : vector<1x128xi1> to vector<8x128xi1>
    %497 = arith.select %496, %494, %489 : vector<8x128xi1>, vector<8x128xf32>
    %498 = vector.shape_cast %4 : vector<1x128xi1> to vector<1x128xi1>
    %499 = vector.broadcast %498 : vector<1x128xi1> to vector<8x128xi1>
    %500 = arith.select %499, %492, %497 : vector<8x128xi1>, vector<8x128xf32>
    %501 = vector.shape_cast %6 : vector<1x128xi1> to vector<1x128xi1>
    %502 = vector.broadcast %501 : vector<1x128xi1> to vector<8x128xi1>
    %503 = arith.select %502, %491, %500 : vector<8x128xi1>, vector<8x128xf32>
    %504 = vector.shape_cast %2 : vector<1x128xi1> to vector<1x128xi1>
    %505 = vector.broadcast %504 : vector<1x128xi1> to vector<8x128xi1>
    %506 = arith.select %505, %493, %490 : vector<8x128xi1>, vector<8x128xf32>
    %507 = vector.shape_cast %4 : vector<1x128xi1> to vector<1x128xi1>
    %508 = vector.broadcast %507 : vector<1x128xi1> to vector<8x128xi1>
    %509 = arith.select %508, %488, %506 : vector<8x128xi1>, vector<8x128xf32>
    %510 = vector.shape_cast %2 : vector<1x128xi1> to vector<1x128xi1>
    %511 = vector.broadcast %510 : vector<1x128xi1> to vector<8x128xi1>
    %512 = arith.select %511, %492, %491 : vector<8x128xi1>, vector<8x128xf32>
    %513 = vector.shape_cast %8 : vector<1x128xi1> to vector<1x128xi1>
    %514 = vector.broadcast %513 : vector<1x128xi1> to vector<8x128xi1>
    %515 = arith.select %514, %491, %492 : vector<8x128xi1>, vector<8x128xf32>
    %516 = vector.shape_cast %8 : vector<1x128xi1> to vector<1x128xi1>
    %517 = vector.broadcast %516 : vector<1x128xi1> to vector<8x128xi1>
    %518 = arith.select %517, %490, %493 : vector<8x128xi1>, vector<8x128xf32>
    %519 = vector.shape_cast %10 : vector<1x128xi1> to vector<1x128xi1>
    %520 = vector.broadcast %519 : vector<1x128xi1> to vector<8x128xi1>
    %521 = arith.select %520, %488, %518 : vector<8x128xi1>, vector<8x128xf32>
    %522 = vector.shape_cast %8 : vector<1x128xi1> to vector<1x128xi1>
    %523 = vector.broadcast %522 : vector<1x128xi1> to vector<8x128xi1>
    %524 = arith.select %523, %489, %494 : vector<8x128xi1>, vector<8x128xf32>
    %525 = vector.shape_cast %10 : vector<1x128xi1> to vector<1x128xi1>
    %526 = vector.broadcast %525 : vector<1x128xi1> to vector<8x128xi1>
    %527 = arith.select %526, %491, %524 : vector<8x128xi1>, vector<8x128xf32>
    %528 = vector.shape_cast %12 : vector<1x128xi1> to vector<1x128xi1>
    %529 = vector.broadcast %528 : vector<1x128xi1> to vector<8x128xi1>
    %530 = arith.select %529, %492, %527 : vector<8x128xi1>, vector<8x128xf32>
    %531 = arith.minimumf %503, %521 : vector<8x128xf32>
    %532 = arith.maximumf %503, %521 : vector<8x128xf32>
    %533 = arith.minimumf %531, %488 : vector<8x128xf32>
    %534 = arith.maximumf %531, %488 : vector<8x128xf32>
    %535 = arith.minimumf %509, %530 : vector<8x128xf32>
    %536 = arith.maximumf %509, %530 : vector<8x128xf32>
    %537 = arith.minimumf %512, %515 : vector<8x128xf32>
    %538 = arith.maximumf %512, %515 : vector<8x128xf32>
    %539 = arith.maximumf %533, %535 : vector<8x128xf32>
    %540 = arith.minimumf %534, %532 : vector<8x128xf32>
    %541 = arith.maximumf %534, %532 : vector<8x128xf32>
    %542 = arith.minimumf %537, %536 : vector<8x128xf32>
    %543 = arith.maximumf %537, %536 : vector<8x128xf32>
    %544 = arith.maximumf %542, %540 : vector<8x128xf32>
    %545 = arith.minimumf %544, %543 : vector<8x128xf32>
    %546 = arith.minimumf %538, %541 : vector<8x128xf32>
    %547 = arith.minimumf %539, %546 : vector<8x128xf32>
    %548 = arith.maximumf %539, %546 : vector<8x128xf32>
    %549 = arith.maximumf %547, %545 : vector<8x128xf32>
    %550 = arith.minimumf %549, %548 : vector<8x128xf32>
    %551 = arith.addf %461, %550 : vector<8x128xf32>
    %552 = vector.extract_strided_slice %551 {offsets = [3, 0], sizes = [4, 128], strides = [1, 1]} : vector<8x128xf32> to vector<4x128xf32>
    %cst_99 = arith.constant 0.166666672 : f32
    %553 = vector.broadcast %cst_99 : f32 to vector<4x128xf32>
    %554 = arith.mulf %552, %553 : vector<4x128xf32>
    %cst_100 = arith.constant 0.000000e+00 : f32
    %555 = vector.broadcast %cst_100 : f32 to vector<4x128xf32>
    %556 = arith.subf %555, %554 : vector<4x128xf32>
    %c0_101 = arith.constant 0 : index
    %c0_102 = arith.constant 0 : index
    %c0_103 = arith.constant 0 : index
    %557 = vector.load %arg7[%c0_101, %c0_102, %c0_103] : memref<1x4x128xf32, #tpu.memory_space<vmem>>, vector<1x4x128xf32>
    %558 = vector.shape_cast %557 : vector<1x4x128xf32> to vector<4x128xf32>
    %559 = vector.shape_cast %556 : vector<4x128xf32> to vector<1x4x128xf32>
    tpu.vector_store %arg7[%c0_101, %c0_102, %c0_103], %559 {strides = array<i32>} : memref<1x4x128xf32, #tpu.memory_space<vmem>>, vector<1x4x128xf32>,
    return
  }
  func.func @transform_0(%arg0: i32) -> (i32, i32, i32, i32) {
    %c1_i32 = arith.constant 1 : i32
    %c0_i32 = arith.constant 0 : i32
    %c0_i32_0 = arith.constant 0 : i32
    %c0_i32_1 = arith.constant 0 : i32
    return %arg0, %c1_i32, %c0_i32, %c0_i32_0 : i32, i32, i32, i32
  }
  func.func @transform_1(%arg0: i32) -> (i32, i32, i32, i32) {
    %c3_i32 = arith.constant 3 : i32
    %c0_i32 = arith.constant 0 : i32
    %c0_i32_0 = arith.constant 0 : i32
    %c0_i32_1 = arith.constant 0 : i32
    return %arg0, %c3_i32, %c0_i32, %c0_i32_0 : i32, i32, i32, i32
  }
  func.func @transform_2(%arg0: i32) -> (i32, i32, i32, i32) {
    %c5_i32 = arith.constant 5 : i32
    %c0_i32 = arith.constant 0 : i32
    %c0_i32_0 = arith.constant 0 : i32
    %c0_i32_1 = arith.constant 0 : i32
    return %arg0, %c5_i32, %c0_i32, %c0_i32_0 : i32, i32, i32, i32
  }
  func.func @transform_3(%arg0: i32) -> (i32, i32, i32, i32) {
    %c0_i32 = arith.constant 0 : i32
    %c0_i32_0 = arith.constant 0 : i32
    %c0_i32_1 = arith.constant 0 : i32
    %c0_i32_2 = arith.constant 0 : i32
    return %arg0, %c0_i32, %c0_i32_0, %c0_i32_1 : i32, i32, i32, i32
  }
  func.func @transform_4(%arg0: i32) -> (i32, i32, i32, i32) {
    %c7_i32 = arith.constant 7 : i32
    %c0_i32 = arith.constant 0 : i32
    %c0_i32_0 = arith.constant 0 : i32
    %c0_i32_1 = arith.constant 0 : i32
    return %arg0, %c7_i32, %c0_i32, %c0_i32_0 : i32, i32, i32, i32
  }
  func.func @transform_5(%arg0: i32) -> (i32, i32, i32, i32) {
    %c2_i32 = arith.constant 2 : i32
    %c0_i32 = arith.constant 0 : i32
    %c0_i32_0 = arith.constant 0 : i32
    %c0_i32_1 = arith.constant 0 : i32
    return %arg0, %c2_i32, %c0_i32, %c0_i32_0 : i32, i32, i32, i32
  }
  func.func @transform_6(%arg0: i32) -> (i32, i32, i32) {
    %c0_i32 = arith.constant 0 : i32
    %c0_i32_0 = arith.constant 0 : i32
    %c0_i32_1 = arith.constant 0 : i32
    return %arg0, %c0_i32, %c0_i32_0 : i32, i32, i32
  }
}

</mosaic_0001>

<bundles_post_ra>
// kernel: tpu_custom_call.1
= control target key start
LH: loop header
LB: loop body
LE: loop exit
PB: predicated region body
PF: predicated region fallthrough
CT: control target
= control target key end

     0   :  { %s2246_s0 = inlined_call_operand.hbm [shape: f32[2,8,8,128], index: 0, kind: input, shape index: {}]   ;;  %s2247_s1 = inlined_call_operand.hbm [shape: f32[2,8,8,128], index: 1, kind: input, shape index: {}]   ;;  %s2248_s2 = inlined_call_operand.hbm [shape: f32[2,8,8,128], index: 2, kind: input, shape index: {}]   ;;  %s2249_s3 = inlined_call_operand.hbm [shape: f32[2,8,8,128], index: 3, kind: input, shape index: {}]   ;;  %s2250_s4 = inlined_call_operand.hbm [shape: f32[2,8,8,128], index: 4, kind: input, shape index: {}]   ;;  %s2251_s5 = inlined_call_operand.hbm [shape: f32[2,8,8,128], index: 5, kind: input, shape index: {}]   ;;  %s2252_s6 = inlined_call_operand.hbm [shape: f32[2,4,128], index: 6, kind: output, shape index: {}]  }
   0x1   :  { %2261 = sst [smem:[#allocation23_spill]] %s2246_s0 }
   0x2   :  { %2262 = sst [smem:[#allocation24_spill]] %s2247_s1 }
   0x3   :  { %2263 = sst [smem:[#allocation25_spill]] %s2248_s2 }
   0x4   :  { %2264 = sst [smem:[#allocation26_spill]] %s2249_s3 }
   0x5   :  { %11 = vsyncpa [#allocation3], 0 }
   0x6   :  { %13 = vsyncpa [#allocation3 + $0x1], 0 }
   0x7   :  { %14 = vsyncpa [#allocation6], 0 }
   0x8   :  { %16 = vsyncpa [#allocation6 + $0x1], 0 }
   0x9   :  { %17 = vsyncpa [#allocation9], 0 }
   0xa   :  { %19 = vsyncpa [#allocation9 + $0x1], 0 }
   0xb   :  { %20 = vsyncpa [#allocation12], 0 }
   0xc   :  { %22 = vsyncpa [#allocation12 + $0x1], 0 }
   0xd   :  { %23 = vsyncpa [#allocation4], 0 }
   0xe   :  { %25 = vsyncpa [#allocation4 + $0x1], 0  ;;  %s1592_s21 = smov 0   ;;  %s1594_s22 = smov 0  }
   0xf   :  { %s1596_s23 = smov 0   ;;  %s1598_s24 = smov 0  }
  0x10 LB: > { %2265 = sst [smem:[#allocation19_spill]] %s1538_s23  ;;  %s1613_s25 = sadd.s32 4294967295, %s1542_s24   ;;  %s1542_s24 = sphi %s1598_s24, %s2290_s24   ;;  %s1538_s23 = sphi %s1596_s23, %s2292_s23   ;;  %s1534_s22 = sphi %s1594_s22, %s2294_s22   ;;  %s1530_s21 = sphi %s1592_s21, %s2293_s21  }
  0x11   : > { %2266 = sst [smem:[#allocation20_spill]] %s1542_s24  ;;  %s1127_s26 = sadd.s32 4294967294, %s1542_s24  }
  0x12   : > { %s1617_s27 = sadd.s32 1, %s1542_s24   ;;  %s38_s28 = sadd.s32 1, %s1538_s23 }
  0x13   : > { %2267 = sst [smem:[#allocation21_spill]] %s1617_s27  ;;  %s35_s29 = ssub.s32 %s1542_s24, %s1617_s27 }
  0x14   : > { %p45_p0 = scmp.ne.s32.totalorder %s1538_s23, %s1534_s22  ;;  %p36_p1 = scmp.eq.s32.totalorder %s35_s29, 0 }
  0x15   : > { %p46_p2 = scmp.eq.s32.totalorder %s1542_s24, 0  ;;  %p51_p3 = scmp.ne.s32.totalorder %s1534_s22, %s1530_s21 }
  0x16   : > { %p52_p4 = scmp.eq.s32.totalorder %s1613_s25, 0  ;;  %p205_p7 = scmp.eq.s32.totalorder %s1613_s25, 1 }
  0x17   : > { %s1629_s30 = scalar_select %p36_p1, %s1538_s23, %s38_s28  }
  0x18   : > { %p47_p5 = por %p46_p2, %p45_p0  ;;  %p1631_p6 = por %p52_p4, %p51_p3 }
  0x19   : > { %2268 = sst [smem:[#allocation22_spill]] %s1629_s30  ;;  %p211_p8 = scmp.eq.s32.totalorder %s1127_s26, 1 }
  0x1a   : > { %s2269_s7 = scalar_select %p1631_p6, 1, 0 }
  0x1b   : > { %p1203_p10 = scmp.lt.s32.totalorder %s1542_s24, 2  ;;  %p1638_p11 = por %p205_p7, %p45_p0 }
  0x1c   : > { %p1642_p12 = por %p211_p8, %p51_p3  ;;  %s1647_s10 = sand.u32 1, %s1538_s23  }
  0x1d   : > { %s2270_s8 = scalar_select %p1638_p11, 1, 0 }
  0x1e   : > { %s2271_s9 = scalar_select %p1642_p12, 1, 0 }
  0x1f   : > { %s1650_s11 = sshll.u32 %s1542_s24, 10  ;;  %s1653_s12 = sshll.u32 %s1647_s10, 3 }
  0x20   : > { %p1655_p13 = pnand %p1203_p10, %p47_p5  ;;  %s251_s14 = sand.u32 1, %s1542_s24  }
  0x21   : > { %s2273_s1 = sld [smem:[#allocation24_spill]]  ;;  %s255_s18 = scalar_lea.vmem [#allocation5], %s1653_s12 }
  0x22   : > { %s2272_s13 = scalar_select %p1655_p13, 1, 0 }
  0x23   : > { %s264_s19 = sshll.u32 %s255_s18, 4  ;;  %s1671_s26 = scalar_lea.sflag [#allocation6], %s251_s14  ;;  %s1667_s19 = int_to_ptr.vmem [resolvable:$true] %s264_s19 }
  0x24   : > { %p1676_p1 = pneg %p1655_p13 }
  0x27   : > { %s983_s17 = scalar_lea.hbm %s2273_s1, %s1650_s11  ;;  %s1284_s18 = scalar_lea.hbm %s2273_s1, 2048 }
  0x28   : > { %s1665_s20 = scalar_lea.hbm %s983_s17, 384  ;;  %s1309_s28 = scalar_lea.hbm %s983_s17, 512 }
  0x29   : > { %p1280_p0 = scmp.ne.s32.totalorder %s1665_s20, %s1309_s28  ;;  %p1285_p4 = scmp.lt.u32.totalorder %s1665_s20, %s2273_s1 }
  0x2a   : > { %p1286_p5 = scmp.lt.u32.totalorder %s1284_s18, %s1309_s28  ;;  %p1288_p8 = scmp.lt.u32.totalorder %s1309_s28, %s1665_s20 }
  0x2b   : > { %p1282_p2 = pnand %p1676_p1, %p1280_p0 }
  0x2c   : > { %p1287_p7 = por %p1286_p5, %p1285_p4 }
  0x2d   : > { %p1283_p3 = pneg %p1282_p2 }
  0x2e   : > { %p1289_p10 = por %p1288_p8, %p1287_p7 }
  0x30   : > { %p1290_p9 = pnand %p1289_p10, %p1283_p3 }
  0x32   : > { %1293 = shalt.err (!%p1290_p9)
}
  0x33   : > { %s1294_s17 = scalar_lea.vmem %s1667_s19, 128  ;;  %s1544_s15 = smov [#allocation5]  }
  0x34   : > { %p1295_p0 = scmp.ne.s32.totalorder %s1667_s19, %s1294_s17  ;;  %s1299_s16 = sshll.u32 %s1544_s15, 4  ;;  %s1300_s16 = int_to_ptr.vmem [resolvable:$false] %s1299_s16 }
  0x35   : > { %s1301_s23 = scalar_lea.vmem %s1300_s16, 256  ;;  %p1302_p11 = scmp.lt.s32.totalorder %s1667_s19, %s1300_s16 }
  0x36   : > { %p1297_p2 = pnand %p1295_p0, %p1676_p1  ;;  %p1303_p6 = scmp.lt.s32.totalorder %s1301_s23, %s1294_s17 }
  0x38   : > { %p1298_p12 = pneg %p1297_p2  ;;  %p1304_p4 = por %p1303_p6, %p1302_p11 }
  0x3a   : > { %p1305_p5 = pnand %p1304_p4, %p1298_p12 }
  0x3c   : > { %1308 = shalt.err (!%p1305_p5)
}
  0x3d   : > { %1186 = dma.hbm_to_vmem [thread:$0]  (!%p1655_p13), %s1665_s20, 128, %s1667_s19, %s1671_s26  }
  0x3e   : > { %p1148_p9 = scmp.ge.s32.totalorder %s1542_s24, 1  ;;  %p348_p3 = scmp.lt.s32.totalorder %s1542_s24, 3 }
  0x3f   : > { %s2276_s3 = sld [smem:[#allocation26_spill]]  ;;  %s295_s15 = scalar_lea.vmem [#allocation8], %s1653_s12 }
  0x40   : > { %p1702_p7 = pnand %p1148_p9, %p348_p3  ;;  %s303_s16 = sshll.u32 %s295_s15, 4  ;;  %s304_s16 = int_to_ptr.vmem [resolvable:$true] %s303_s16 }
  0x41   : > { %s1715_s19 = scalar_lea.sflag [#allocation9], %s251_s14 }
  0x42   : > { %s2275_s30 = scalar_select %p1702_p7, 1, 0 }
  0x45   : > { %s1710_s17 = scalar_lea.hbm %s2276_s3, %s1650_s11  ;;  %s1315_s28 = scalar_lea.hbm %s2276_s3, 2048 }
  0x46   : > { %s1310_s20 = scalar_lea.hbm %s1710_s17, 128  ;;  %p1316_p8 = scmp.lt.u32.totalorder %s1710_s17, %s2276_s3 }
  0x47   : > { %p1311_p6 = scmp.ne.s32.totalorder %s1710_s17, %s1310_s20  ;;  %p1317_p10 = scmp.lt.u32.totalorder %s1315_s28, %s1310_s20 }
  0x48   : > { %p1319_p2 = scmp.lt.u32.totalorder %s1310_s20, %s1710_s17 }
  0x49   : > { %p1313_p11 = pnand %p1311_p6, %p1676_p1  ;;  %p1318_p0 = por %p1317_p10, %p1316_p8 }
  0x4b   : > { %p1314_p12 = pneg %p1313_p11  ;;  %p1320_p4 = por %p1319_p2, %p1318_p0 }
  0x4d   : > { %p1321_p5 = pnand %p1320_p4, %p1314_p12 }
  0x4f   : > { %1324 = shalt.err (!%p1321_p5)
}
  0x50   : > { %s1325_s14 = scalar_lea.vmem %s304_s16, 128  ;;  %s1545_s15 = smov [#allocation8]  }
  0x51   : > { %p1326_p9 = scmp.ne.s32.totalorder %s304_s16, %s1325_s14  ;;  %s1330_s24 = sshll.u32 %s1545_s15, 4  ;;  %s1331_s24 = int_to_ptr.vmem [resolvable:$false] %s1330_s24 }
  0x52   : > { %s1332_s1 = scalar_lea.vmem %s1331_s24, 256  ;;  %p1333_p11 = scmp.lt.s32.totalorder %s304_s16, %s1331_s24 }
  0x53   : > { %p1328_p3 = pnand %p1326_p9, %p1676_p1  ;;  %p1334_p7 = scmp.lt.s32.totalorder %s1332_s1, %s1325_s14 }
  0x55   : > { %p1329_p6 = pneg %p1328_p3  ;;  %p1335_p13 = por %p1334_p7, %p1333_p11 }
  0x57   : > { %p1336_p8 = pnand %p1335_p13, %p1329_p6 }
  0x59   : > { %1339 = shalt.err (!%p1336_p8)
}
  0x5a   : > { %p2277_p10 = scmp.ne.s32.totalorder %s2272_s13, 0  ;;  %s2278_s0 = sld [smem:[#allocation23_spill]] }
  0x5b   : > { %s235_s28 = scalar_lea.vmem [#allocation2], %s1653_s12  ;;  %s232_s14 = scalar_lea.sflag [#allocation3], %s1647_s10 }
  0x5c   : > { %1192 = dma.hbm_to_vmem [thread:$0]  (!%p2277_p10), %s1710_s17, 128, %s304_s16, %s1715_s19  }
  0x5d   : > { %s244_s18 = sshll.u32 %s235_s28, 4  ;;  %s245_s18 = int_to_ptr.vmem [resolvable:$true] %s244_s18 }
  0x60   : > { %s976_s23 = scalar_lea.hbm %s2278_s0, %s1650_s11  ;;  %s1345_s16 = scalar_lea.hbm %s2278_s0, 2048 }
  0x61   : > { %s1740_s24 = scalar_lea.hbm %s976_s23, 128  ;;  %s1370_s15 = scalar_lea.hbm %s976_s23, 256 }
  0x62   : > { %p1341_p13 = scmp.ne.s32.totalorder %s1740_s24, %s1370_s15  ;;  %p1346_p0 = scmp.lt.u32.totalorder %s1740_s24, %s2278_s0 }
  0x63   : > { %p1347_p2 = scmp.lt.u32.totalorder %s1345_s16, %s1370_s15  ;;  %p1349_p5 = scmp.lt.u32.totalorder %s1370_s15, %s1740_s24 }
  0x64   : > { %p1343_p7 = pnand %p1341_p13, %p1676_p1 }
  0x65   : > { %p1348_p4 = por %p1347_p2, %p1346_p0 }
  0x66   : > { %p1344_p12 = pneg %p1343_p7 }
  0x67   : > { %p1350_p9 = por %p1349_p5, %p1348_p4 }
  0x69   : > { %p1351_p3 = pnand %p1350_p9, %p1344_p12 }
  0x6b   : > { %1354 = shalt.err (!%p1351_p3)
}
  0x6c   : > { %s1355_s28 = scalar_lea.vmem %s245_s18, 128  ;;  %s1546_s23 = smov [#allocation2]  }
  0x6d   : > { %p1356_p6 = scmp.ne.s32.totalorder %s245_s18, %s1355_s28  ;;  %s1360_s3 = sshll.u32 %s1546_s23, 4  ;;  %s1361_s3 = int_to_ptr.vmem [resolvable:$false] %s1360_s3 }
  0x6e   : > { %s1362_s1 = scalar_lea.vmem %s1361_s3, 256  ;;  %p1363_p13 = scmp.lt.s32.totalorder %s245_s18, %s1361_s3 }
  0x6f   : > { %p1358_p11 = pnand %p1356_p6, %p1676_p1  ;;  %p1364_p7 = scmp.lt.s32.totalorder %s1362_s1, %s1355_s28 }
  0x71   : > { %p1359_p8 = pneg %p1358_p11  ;;  %p1365_p10 = por %p1364_p7, %p1363_p13 }
  0x73   : > { %p1366_p0 = pnand %p1365_p10, %p1359_p8 }
  0x75   : > { %1369 = shalt.err (!%p1366_p0)
}
  0x76   : > { %p2279_p2 = scmp.ne.s32.totalorder %s2272_s13, 0  ;;  %s2280_s2 = sld [smem:[#allocation25_spill]] }
  0x77   : > { %s275_s3 = scalar_lea.vmem [#allocation7], %s1653_s12 }
  0x78   : > { %1183 = dma.hbm_to_vmem [thread:$0]  (!%p2279_p2), %s1740_s24, 128, %s245_s18, %s232_s14  }
  0x79   : > { %s284_s20 = sshll.u32 %s275_s3, 4  ;;  %s285_s20 = int_to_ptr.vmem [resolvable:$true] %s284_s20 }
  0x7c   : > { %s990_s16 = scalar_lea.hbm %s2280_s2, %s1650_s11  ;;  %s1376_s18 = scalar_lea.hbm %s2280_s2, 2048 }
  0x7d   : > { %s1763_s27 = scalar_lea.hbm %s990_s16, 640  ;;  %s1401_s28 = scalar_lea.hbm %s990_s16, 768 }
  0x7e   : > { %p1372_p10 = scmp.ne.s32.totalorder %s1763_s27, %s1401_s28  ;;  %p1377_p5 = scmp.lt.u32.totalorder %s1763_s27, %s2280_s2 }
  0x7f   : > { %p1378_p9 = scmp.lt.u32.totalorder %s1376_s18, %s1401_s28  ;;  %p1380_p6 = scmp.lt.u32.totalorder %s1401_s28, %s1763_s27 }
  0x80   : > { %p1374_p12 = pnand %p1372_p10, %p1676_p1 }
  0x81   : > { %p1379_p3 = por %p1378_p9, %p1377_p5 }
  0x82   : > { %p1375_p4 = pneg %p1374_p12 }
  0x83   : > { %p1381_p11 = por %p1380_p6, %p1379_p3 }
  0x85   : > { %p1382_p8 = pnand %p1381_p11, %p1375_p4 }
  0x87   : > { %1385 = shalt.err (!%p1382_p8)
}
  0x88   : > { %s1386_s15 = scalar_lea.vmem %s285_s20, 128  ;;  %s1547_s17 = smov [#allocation7]  }
  0x89   : > { %p1387_p13 = scmp.ne.s32.totalorder %s285_s20, %s1386_s15  ;;  %s1391_s16 = sshll.u32 %s1547_s17, 4  ;;  %s1392_s16 = int_to_ptr.vmem [resolvable:$false] %s1391_s16 }
  0x8a   : > { %s1393_s3 = scalar_lea.vmem %s1392_s16, 256  ;;  %p1394_p10 = scmp.lt.s32.totalorder %s285_s20, %s1392_s16 }
  0x8b   : > { %p1389_p7 = pnand %p1387_p13, %p1676_p1  ;;  %p1395_p12 = scmp.lt.s32.totalorder %s1393_s3, %s1386_s15 }
  0x8d   : > { %p1390_p0 = pneg %p1389_p7  ;;  %p1396_p2 = por %p1395_p12, %p1394_p10 }
  0x8f   : > { %p1397_p5 = pnand %p1396_p2, %p1390_p0 }
  0x91   : > { %1400 = shalt.err (!%p1397_p5)
}
  0x92   : > { %p2281_p9 = scmp.ne.s32.totalorder %s2272_s13, 0  ;;  %s1002_s1 = scalar_lea.hbm %s2250_s4, %s1650_s11 }
  0x93   : > { %s314_s18 = scalar_lea.vmem [#allocation10], %s1653_s12  ;;  %s1003_s14 = scalar_lea.hbm %s1002_s1, 896 }
  0x94   : > { %1189 = dma.hbm_to_vmem [thread:$0]  (!%p2281_p9), %s1763_s27, 128, %s285_s20, %s1671_s26  }
  0x95   : > { %s323_s24 = sshll.u32 %s314_s18, 4  ;;  %s1432_s15 = scalar_lea.hbm %s1002_s1, 1024  ;;  %s324_s24 = int_to_ptr.vmem [resolvable:$true] %s323_s24 }
  0x96   : > { %p1403_p4 = scmp.ne.s32.totalorder %s1003_s14, %s1432_s15  ;;  %s1407_s3 = scalar_lea.hbm %s2250_s4, 2048 }
  0x97   : > { %p1408_p6 = scmp.lt.u32.totalorder %s1003_s14, %s2250_s4  ;;  %p1409_p11 = scmp.lt.u32.totalorder %s1407_s3, %s1432_s15 }
  0x98   : > { %p1405_p2 = pnand %p1403_p4, %p1676_p1  ;;  %p1411_p13 = scmp.lt.u32.totalorder %s1432_s15, %s1003_s14 }
  0x99   : > { %p1410_p8 = por %p1409_p11, %p1408_p6 }
  0x9a   : > { %p1406_p3 = pneg %p1405_p2 }
  0x9b   : > { %p1412_p7 = por %p1411_p13, %p1410_p8 }
  0x9d   : > { %p1413_p0 = pnand %p1412_p7, %p1406_p3 }
  0x9f   : > { %1416 = shalt.err (!%p1413_p0)
}
  0xa0   : > { %s1417_s26 = scalar_lea.vmem %s324_s24, 128  ;;  %s1548_s27 = smov [#allocation10]  }
  0xa1   : > { %p1418_p10 = scmp.ne.s32.totalorder %s324_s24, %s1417_s26  ;;  %s1422_s20 = sshll.u32 %s1548_s27, 4  ;;  %s1423_s20 = int_to_ptr.vmem [resolvable:$false] %s1422_s20 }
  0xa2   : > { %s1424_s28 = scalar_lea.vmem %s1423_s20, 256  ;;  %p1425_p4 = scmp.lt.s32.totalorder %s324_s24, %s1423_s20 }
  0xa3   : > { %p1420_p12 = pnand %p1418_p10, %p1676_p1  ;;  %p1426_p2 = scmp.lt.s32.totalorder %s1424_s28, %s1417_s26 }
  0xa5   : > { %p1421_p5 = pneg %p1420_p12  ;;  %p1427_p9 = por %p1426_p2, %p1425_p4 }
  0xa7   : > { %p1428_p6 = pnand %p1427_p9, %p1421_p5 }
  0xa9   : > { %1431 = shalt.err (!%p1428_p6)
}
  0xaa   : > { %p2282_p11 = scmp.ne.s32.totalorder %s2272_s13, 0  ;;  %s1009_s23 = scalar_lea.hbm %s2251_s5, %s1650_s11 }
  0xab   : > { %s334_s1 = scalar_lea.vmem [#allocation11], %s1653_s12  ;;  %s1806_s15 = scalar_lea.hbm %s1009_s23, 256 }
  0xac   : > { %1195 = dma.hbm_to_vmem [thread:$0]  (!%p2282_p11), %s1003_s14, 128, %s324_s24, %s1715_s19  }
  0xad   : > { %s343_s18 = sshll.u32 %s334_s1, 4  ;;  %s331_s17 = scalar_lea.sflag [#allocation12], %s1647_s10  ;;  %s344_s18 = int_to_ptr.vmem [resolvable:$true] %s343_s18 }
  0xae   : > { %s1463_s16 = scalar_lea.hbm %s1009_s23, 384  ;;  %s1438_s24 = scalar_lea.hbm %s2251_s5, 2048 }
  0xaf   : > { %p1434_p9 = scmp.ne.s32.totalorder %s1806_s15, %s1463_s16  ;;  %p1439_p13 = scmp.lt.u32.totalorder %s1806_s15, %s2251_s5 }
  0xb0   : > { %p1440_p7 = scmp.lt.u32.totalorder %s1438_s24, %s1463_s16  ;;  %p1442_p10 = scmp.lt.u32.totalorder %s1463_s16, %s1806_s15 }
  0xb1   : > { %p1436_p3 = pnand %p1434_p9, %p1676_p1 }
  0xb2   : > { %p1441_p0 = por %p1440_p7, %p1439_p13 }
  0xb3   : > { %p1437_p8 = pneg %p1436_p3 }
  0xb4   : > { %p1443_p12 = por %p1442_p10, %p1441_p0 }
  0xb6   : > { %p1444_p5 = pnand %p1443_p12, %p1437_p8 }
  0xb8   : > { %1447 = shalt.err (!%p1444_p5)
}
  0xb9   : > { %s1448_s10 = scalar_lea.vmem %s344_s18, 128  ;;  %s1549_s12 = smov [#allocation11]  }
  0xba   : > { %p1449_p4 = scmp.ne.s32.totalorder %s344_s18, %s1448_s10  ;;  %s1453_s26 = sshll.u32 %s1549_s12, 4  ;;  %s1454_s26 = int_to_ptr.vmem [resolvable:$false] %s1453_s26 }
  0xbb   : > { %s1455_s27 = scalar_lea.vmem %s1454_s26, 256  ;;  %p1456_p9 = scmp.lt.s32.totalorder %s344_s18, %s1454_s26 }
  0xbc   : > { %p1451_p2 = pnand %p1449_p4, %p1676_p1  ;;  %p1457_p3 = scmp.lt.s32.totalorder %s1455_s27, %s1448_s10 }
  0xbe   : > { %p1452_p6 = pneg %p1451_p2  ;;  %p1458_p11 = por %p1457_p3, %p1456_p9 }
  0xc0   : > { %p1459_p7 = pnand %p1458_p11, %p1452_p6 }
  0xc2   : > { %1462 = shalt.err (!%p1459_p7)
}
  0xc3   : > { %p2283_p13 = scmp.ne.s32.totalorder %s2272_s13, 0  ;;  %p2284_p8 = scmp.ne.s32.totalorder %s2275_s30, 0 }
  0xc4   : > { %s1828_s29 = sand.u32 (!%p2284_p8), 1, %s1534_s22   ;;  %p2285_p1 = scmp.ne.s32.totalorder (!%p2284_p8), %s2269_s7, 0 }
  0xc5   : > { %1198 = dma.hbm_to_vmem [thread:$0]  (!%p2283_p13), %s1806_s15, 128, %s344_s18, %s331_s17  }
  0xc6   : > { %352 = sbr.rel (%p2284_p8) target bundleno = 797 (0x31d), region = 44  ;;  %s1831_s20 = sshll.u32 (!%p2284_p8), %s1828_s29, 3 }
  0xc7   : > { %s355_s28 = scalar_lea.sflag (!%p2284_p8), [#allocation3], %s1828_s29  ;;  %s358_s0 = scalar_lea.vmem (!%p2284_p8), [#allocation2], %s1831_s20 }
  0xcd   : > { %1509 = dma.done.wait (%p2285_p1), %s355_s28, 128  }
  0xce   : > { %1511 = vsyncadd (%p2285_p1), %s355_s28, 4294967168  ;;  %s363_s13 = sand.u32 1, %s1613_s25   ;;  %s367_s2 = scalar_lea.vmem [#allocation5], %s1831_s20 }
  0xcf   : > { %s364_s30 = scalar_lea.sflag [#allocation6], %s363_s13 }
  0xd0   : > { %1513 = dma.done.wait (%p2285_p1), %s364_s30, 256  }
  0xd1   : > { %1515 = vsyncadd (%p2285_p1), %s364_s30, 4294967040  ;;  %s376_s23 = scalar_lea.vmem [#allocation7], %s1831_s20  ;;  %s382_s1 = scalar_lea.sflag [#allocation9], %s363_s13 }
  0xd2   : > { %s385_s18 = scalar_lea.vmem [#allocation8], %s1831_s20 }
  0xd3   : > { %1517 = dma.done.wait (%p2285_p1), %s382_s1, 256  }
  0xd4   : > { %1519 = vsyncadd (%p2285_p1), %s382_s1, 4294967040  ;;  %s394_s15 = scalar_lea.vmem [#allocation10], %s1831_s20  ;;  %s400_s17 = scalar_lea.sflag [#allocation12], %s1828_s29 }
  0xd5   : > { %s403_s16 = scalar_lea.vmem [#allocation11], %s1831_s20 }
  0xd6   : > { %1521 = dma.done.wait (%p2285_p1), %s400_s17, 128  }
  0xd7   : > { %1523 = vsyncadd (%p2285_p1), %s400_s17, 4294967168  ;;  %v465_v0 = vld [vmem:[%s358_s0] sm:$0xff]  ;;  %v551_v2 = vld [vmem:[%s367_s2] sm:$0xff]  ;;  %s1550_s7 = smov 2   ;;  %s1551_s3 = smov 3  }
  0xd8   : > { %v625_v1 = vld [vmem:[%s376_s23] sm:$0xff]  ;;  %466 = vmax.xlane.f32.xlu0 %v465_v0  ;;  %v699_v3 = vld [vmem:[%s385_s18] sm:$0xff]  ;;  %s1552_s19 = smov 1   ;;  %s1553_s24 = smov 126  }
  0xd9   : > { %626 = vmax.xlane.f32.xlu1 %v625_v1  ;;  %v773_v4 = vld [vmem:[%s394_s15] sm:$0xff]  ;;  %v847_v5 = vld [vmem:[%s403_s16] sm:$0xff]  ;;  %s1554_s14 = smov 127   ;;  %s1555_s11 = smov 125  }
  0xda   : > { %s1155_s10 = sshll.u32 %s1828_s29, 2  ;;  %s1157_s12 = sshll.u32 %s1613_s25, 6 }
  0xdb   : > { %s456_s26 = scalar_lea.vmem [#allocation13], %s1155_s10  ;;  %s2202_s0 = scalar_lea.hbm %s2252_s6, %s1157_s12 }
  0xdc   : > { %552 = vmax.xlane.f32.xlu0 %v551_v2  ;;  %s938_s27 = sshll.u32 %s456_s26, 4  ;;  %s925_s13 = scalar_lea.sflag [#allocation4], %s1828_s29  ;;  %s2204_s27 = int_to_ptr.vmem [resolvable:$true] %s938_s27 }
  0xdd   : > { %700 = vmax.xlane.f32.xlu1 %v699_v3  ;;  %s1464_s30 = scalar_lea.vmem %s2204_s27, 64  ;;  %p2286_p0 = scmp.ne.s32.totalorder %s2270_s8, 0 }
  0xde   : > { %p1465_p11 = scmp.ne.s32.totalorder %s2204_s27, %s1464_s30  ;;  %s1556_s25 = smov [#allocation13]  }
  0xdf   : > { %s1468_s2 = sshll.u32 %s1556_s25, 4  ;;  %s1469_s2 = int_to_ptr.vmem [resolvable:$false] %s1468_s2 }
  0xe0   : > { %774 = vmax.xlane.f32.xlu0 %v773_v4  ;;  %p1466_p10 = pnand %p1465_p11, %p2286_p0  ;;  %s1470_s23 = scalar_lea.vmem %s1469_s2, 128 }
  0xe1   : > { %848 = vmax.xlane.f32.xlu1 %v847_v5  ;;  %p1471_p5 = scmp.lt.s32.totalorder %s2204_s27, %s1469_s2  ;;  %p1472_p4 = scmp.lt.s32.totalorder %s1470_s23, %s1464_s30 }
  0xe2   : > { %p1467_p12 = pneg %p1466_p10 }
  0xe3   : > { %p1473_p2 = por %p1472_p4, %p1471_p5 }
  0xe5   : > { %p1474_p6 = pnand %p1473_p2, %p1467_p12 }
 0x165   : > { %v467_v6 = vpop.xlane.xlu0 %466 }
 0x166   : > { %v627_v7 = vpop.xlane.xlu1 %626  ;;  %v468_v8 = vsub.f32 %v465_v0, %v467_v6 }
 0x167   : > { %v628_v9 = vsub.f32 %v625_v1, %v627_v7 }
 0x168   : > { %v469_v10 = vmul.f32 1.442695, %v468_v8 }
 0x169   : > { %v629_v11 = vmul.f32 1.442695, %v628_v9  ;;  %v553_v12 = vpop.xlane.xlu0 %552 }
 0x16a   : > { %v701_v13 = vpop.xlane.xlu1 %700  ;;  %1243 = vpow2.f32 %v469_v10  ;;  %v554_v14 = vsub.f32 %v551_v2, %v553_v12 }
 0x16b   : > { %v702_v15 = vsub.f32 %v699_v3, %v701_v13  ;;  %1245 = vpow2.f32 %v629_v11 }
 0x16c   : > { %v555_v16 = vmul.f32 1.442695, %v554_v14 }
 0x16d   : > { %v703_v17 = vmul.f32 1.442695, %v702_v15  ;;  %v775_v18 = vpop.xlane.xlu0 %774 }
 0x16e   : > { %v849_v19 = vpop.xlane.xlu1 %848  ;;  %1247 = vpow2.f32 %v555_v16  ;;  %v776_v20 = vsub.f32 %v773_v4, %v775_v18 }
 0x16f   : > { %v850_v21 = vsub.f32 %v847_v5, %v849_v19  ;;  %1249 = vpow2.f32 %v703_v17 }
 0x170   : > { %v777_v22 = vmul.f32 1.442695, %v776_v20 }
 0x171   : > { %v851_v23 = vmul.f32 1.442695, %v850_v21 }
 0x172   : > { %1251 = vpow2.f32 %v777_v22 }
 0x173   : > { %1253 = vpow2.f32 %v851_v23 }
 0x174   : > { %v1244_v24 = vpop.eup %1243 }
 0x175   : > { %471 = vadd.xlane.f32.xlu0 %v1244_v24  ;;  %v1246_v25 = vpop.eup %1245 }
 0x178   : > { %v1248_v26 = vpop.eup %1247 }
 0x179   : > { %631 = vadd.xlane.f32.xlu0 %v1246_v25  ;;  %557 = vadd.xlane.f32.xlu1 %v1248_v26  ;;  %v1250_v27 = vpop.eup %1249 }
 0x17c   : > { %v1252_v28 = vpop.eup %1251 }
 0x17d   : > { %705 = vadd.xlane.f32.xlu1 %v1250_v27  ;;  %779 = vadd.xlane.f32.xlu0 %v1252_v28  ;;  %v1254_v29 = vpop.eup %1253 }
 0x181   : > { %853 = vadd.xlane.f32.xlu1 %v1254_v29 }
 0x202   : > { %v472_v30 = vpop.xlane.xlu0 %471 }
 0x203   : > { %1255 = vrcp.f32 %v472_v30 }
 0x206   : > { %v558_v31 = vpop.xlane.xlu1 %557  ;;  %v632_v32 = vpop.xlane.xlu0 %631 }
 0x207   : > { %1257 = vrcp.f32 %v558_v31 }
 0x208   : > { %1259 = vrcp.f32 %v632_v32 }
 0x20a   : > { %v706_v33 = vpop.xlane.xlu1 %705  ;;  %v780_v34 = vpop.xlane.xlu0 %779 }
 0x20b   : > { %1261 = vrcp.f32 %v706_v33 }
 0x20c   : > { %1263 = vrcp.f32 %v780_v34 }
 0x20d   : > { %v1256_v35 = vpop.eup %1255 }
 0x20e   : > { %v475_v36 = vmul.f32 %v1256_v35, %v1244_v24  ;;  %v854_v39 = vpop.xlane.xlu1 %853 }
 0x20f   : > { %1265 = vrcp.f32 %v854_v39 }
 0x210   : > { %v476_v37 = vrot.slane %v475_v36, 4 }
 0x211   : > { %v1258_v38 = vpop.eup %1257 }
 0x212   : > { %v1260_v40 = vpop.eup %1259  ;;  %v477_v41 = vadd.f32 %v476_v37, %v475_v36  ;;  %v561_v42 = vmul.f32 %v1258_v38, %v1248_v26 }
 0x213   : > { %v635_v43 = vmul.f32 %v1260_v40, %v1246_v25 }
 0x214   : > { %v478_v44 = vrot.slane %v477_v41, 2  ;;  %v562_v45 = vrot.slane %v561_v42, 4 }
 0x215   : > { %v1262_v46 = vpop.eup %1261  ;;  %v636_v47 = vrot.slane %v635_v43, 4 }
 0x216   : > { %v1264_v48 = vpop.eup %1263  ;;  %v479_v49 = vadd.f32 %v478_v44, %v477_v41  ;;  %v563_v50 = vadd.f32 %v562_v45, %v561_v42  ;;  %v709_v51 = vmul.f32 %v1262_v46, %v1250_v27 }
 0x217   : > { %v637_v52 = vadd.f32 %v636_v47, %v635_v43  ;;  %v1858_v53 = vmul.f32 %v1264_v48, %v1252_v28 }
 0x218   : > { %v480_v54 = vrot.slane %v479_v49, 1  ;;  %v564_v55 = vrot.slane %v563_v50, 2  ;;  %v710_v56 = vrot.slane %v709_v51, 4 }
 0x219   : > { %v638_v57 = vrot.slane %v637_v52, 2  ;;  %v784_v58 = vrot.slane %v1858_v53, 4  ;;  %v1266_v4 = vpop.eup %1265 }
 0x21a   : > { %v481_v59 = vadd.f32 %v480_v54, %v479_v49  ;;  %v565_v60 = vadd.f32 %v564_v55, %v563_v50  ;;  %v711_v61 = vadd.f32 %v710_v56, %v709_v51  ;;  %v1862_v14 = vmul.f32 %v1266_v4, %v1254_v29 }
 0x21b   : > { %v639_v62 = vadd.f32 %v638_v57, %v637_v52  ;;  %v785_v3 = vadd.f32 %v784_v58, %v1858_v53 }
 0x21c   : > { %v483_v63 = vmul.f32 0.125, %v481_v59  ;;  %v566_v0 = vrot.slane %v565_v60, 1  ;;  %v712_v1 = vrot.slane %v711_v61, 2  ;;  %v858_v23 = vrot.slane %v1862_v14, 4 }
 0x21d   : > { %v640_v2 = vrot.slane %v639_v62, 1  ;;  %v786_v13 = vrot.slane %v785_v3, 2 }
 0x21e   : > { %v484_v5 = vsub.f32 %v475_v36, %v483_v63  ;;  %v567_v6 = vadd.f32 %v566_v0, %v565_v60  ;;  %v713_v7 = vadd.f32 %v712_v1, %v711_v61  ;;  %v859_v31 = vadd.f32 %v858_v23, %v1862_v14 }
 0x21f   : > { %v641_v8 = vadd.f32 %v640_v2, %v639_v62  ;;  %v787_v22 = vadd.f32 %v786_v13, %v785_v3 }
 0x220   : > { %v485_v9 = vmul.f32 %v484_v5, %v484_v5  ;;  %v568_v10 = vmul.f32 0.125, %v567_v6  ;;  %v714_v11 = vrot.slane %v713_v7, 1  ;;  %v860_v39 = vrot.slane %v859_v31, 2 }
 0x221   : > { %v642_v12 = vmul.f32 0.125, %v641_v8  ;;  %v788_v30 = vrot.slane %v787_v22, 1 }
 0x222   : > { %v486_v15 = vrot.slane %v485_v9, 4  ;;  %v1864_v16 = vsub.f32 %v561_v42, %v568_v10  ;;  %v715_v17 = vadd.f32 %v714_v11, %v713_v7  ;;  %v861_v45 = vadd.f32 %v860_v39, %v859_v31 }
 0x223   : > { %v1866_v18 = vsub.f32 %v635_v43, %v642_v12  ;;  %v789_v38 = vadd.f32 %v788_v30, %v787_v22  ;;  %v457_v30 = vlaneseq }
 0x224   : > { %v487_v19 = vadd.f32 %v486_v15, %v485_v9  ;;  %v570_v20 = vmul.f32 %v1864_v16, %v1864_v16  ;;  %v716_v26 = vmul.f32 0.125, %v715_v17  ;;  %v862_v50 = vrot.slane %v861_v45, 1 }
 0x225   : > { %v644_v21 = vmul.f32 %v1866_v18, %v1866_v18  ;;  %v790_v49 = vmul.f32 0.125, %v789_v38 }
 0x226   : > { %v488_v24 = vrot.slane %v487_v19, 2  ;;  %v571_v25 = vrot.slane %v570_v20, 4  ;;  %v1874_v35 = vsub.f32 %v709_v51, %v716_v26  ;;  %v863_v59 = vadd.f32 %v862_v50, %v861_v45 }
 0x227   : > { %v645_v27 = vrot.slane %v644_v21, 4  ;;  %v1879_v54 = vsub.f32 %v1858_v53, %v790_v49 }
 0x228   : > { %v489_v28 = vadd.f32 %v488_v24, %v487_v19  ;;  %v572_v29 = vadd.f32 %v571_v25, %v570_v20  ;;  %v718_v43 = vmul.f32 %v1874_v35, %v1874_v35  ;;  %v864_v63 = vmul.f32 0.125, %v863_v59 }
 0x229   : > { %v646_v34 = vadd.f32 %v645_v27, %v644_v21  ;;  %v792_v58 = vmul.f32 %v1879_v54, %v1879_v54 }
 0x22a   : > { %v490_v32 = vrot.slane %v489_v28, 1  ;;  %v573_v33 = vrot.slane %v572_v29, 2  ;;  %v719_v48 = vrot.slane %v718_v43, 4  ;;  %v865_v3 = vsub.f32 %v1862_v14, %v864_v63 }
 0x22b   : > { %v647_v42 = vrot.slane %v646_v34, 2  ;;  %v793_v62 = vrot.slane %v792_v58, 4 }
 0x22c   : > { %v491_v36 = vadd.f32 %v490_v32, %v489_v28  ;;  %v574_v37 = vadd.f32 %v573_v33, %v572_v29  ;;  %v720_v52 = vadd.f32 %v719_v48, %v718_v43  ;;  %v866_v7 = vmul.f32 %v865_v3, %v865_v3 }
 0x22d   : > { %v648_v47 = vadd.f32 %v647_v42, %v646_v34  ;;  %v794_v2 = vadd.f32 %v793_v62, %v792_v58  ;;  %v1972_v33 = vand.u32 127, %v457_v30 }
 0x22e   : > { %v492_v40 = vmul.f32 0.125, %v491_v36  ;;  %v575_v41 = vrot.slane %v574_v37, 1  ;;  %v721_v57 = vrot.slane %v720_v52, 2  ;;  %v867_v10 = vrot.slane %v866_v7, 4 }
 0x22f   : > { %v649_v51 = vrot.slane %v648_v47, 1  ;;  %v795_v6 = vrot.slane %v794_v2, 2  ;;  %vm459_vm0 = vcmp.eq.s32.totalorder %v1972_v33, 0  ;;  %vm462_vm1 = vcmp.eq.s32.totalorder %v1972_v33, 127 }
 0x230   : > { %1267 = vrsqrt.f32 %v492_v40  ;;  %v576_v44 = vadd.f32 %v575_v41, %v574_v37  ;;  %v722_v53 = vadd.f32 %v721_v57, %v720_v52  ;;  %v868_v13 = vadd.f32 %v867_v10, %v866_v7 }
 0x231   : > { %v650_v56 = vadd.f32 %v649_v51, %v648_v47  ;;  %v796_v9 = vadd.f32 %v795_v6, %v794_v2  ;;  %vm460_vm2 = vcmp.eq.s32.totalorder %v1972_v33, 1  ;;  %vm463_vm3 = vcmp.eq.s32.totalorder %v1972_v33, 126 }
 0x232   : > { %v577_v46 = vmul.f32 0.125, %v576_v44  ;;  %v723_v1 = vrot.slane %v722_v53, 1  ;;  %vm461_vm4 = vcmp.eq.s32.totalorder %v1972_v33, 2  ;;  %vm464_vm5 = vcmp.eq.s32.totalorder %v1972_v33, 125 }
 0x233   : > { %v651_v61 = vmul.f32 0.125, %v650_v56  ;;  %v797_v12 = vrot.slane %v796_v9, 1 }
 0x234   : > { %1269 = vrsqrt.f32 %v577_v46 }
 0x235   : > { %1271 = vrsqrt.f32 %v651_v61  ;;  %v798_v15 = vadd.f32 %v797_v12, %v796_v9 }
 0x237   : > { %v799_v17 = vmul.f32 0.125, %v798_v15 }
 0x23a   : > { %v1268_v55 = vpop.eup %1267 }
 0x23b   : > { %v1883_v60 = vmul.f32 %v1268_v55, %v484_v5  ;;  %v724_v5 = vadd.f32 %v723_v1, %v722_v53 }
 0x23d   : > { %497 = vrot.lane.b32.xlu1 %v1883_v60, %s1550_s7  ;;  %495 = vrot.lane.b32.xlu0 %v1883_v60, %s1551_s3  ;;  %v725_v8 = vmul.f32 0.125, %v724_v5 }
 0x23e   : > { %v1270_v0 = vpop.eup %1269 }
 0x23f   : > { %v1895_v4 = vmul.f32 %v1270_v0, %v1864_v16  ;;  %v1272_v11 = vpop.eup %1271  ;;  %1273 = vrsqrt.f32 %v725_v8  ;;  %v869_v16 = vrot.slane %v868_v13, 2 }
 0x240   : > { %v1910_v14 = vmul.f32 %v1272_v11, %v1866_v18  ;;  %1275 = vrsqrt.f32 %v799_v17 }
 0x241   : > { %499 = vrot.lane.b32.xlu1 %v1883_v60, %s1552_s19  ;;  %503 = vrot.lane.b32.xlu0 %v1883_v60, %s1553_s24  ;;  %v870_v19 = vadd.f32 %v869_v16, %v868_v13 }
 0x243   : > { %v871_v18 = vrot.slane %v870_v19, 1 }
 0x245   : > { %501 = vrot.lane.b32.xlu1 %v1883_v60, %s1554_s14  ;;  %580 = vrot.lane.b32.xlu0 %v1895_v4, %s1551_s3  ;;  %v872_v22 = vadd.f32 %v871_v18, %v870_v19 }
 0x247   : > { %v873_v23 = vmul.f32 0.125, %v872_v22 }
 0x249   : > { %505 = vrot.lane.b32.xlu1 %v1883_v60, %s1555_s11  ;;  %584 = vrot.lane.b32.xlu0 %v1895_v4, %s1552_s19  ;;  %v1274_v20 = vpop.eup %1273  ;;  %1277 = vrsqrt.f32 %v873_v23 }
 0x24a   : > { %v1925_v21 = vmul.f32 %v1274_v20, %v1874_v35  ;;  %v1276_v24 = vpop.eup %1275 }
 0x24b   : > { %v1940_v25 = vmul.f32 %v1276_v24, %v1879_v54 }
 0x24d   : > { %582 = vrot.lane.b32.xlu1 %v1895_v4, %s1550_s7  ;;  %588 = vrot.lane.b32.xlu0 %v1895_v4, %s1553_s24 }
 0x251   : > { %586 = vrot.lane.b32.xlu1 %v1895_v4, %s1554_s14  ;;  %654 = vrot.lane.b32.xlu0 %v1910_v14, %s1551_s3 }
 0x253   : > { %v1278_v26 = vpop.eup %1277 }
 0x254   : > { %v1954_v27 = vmul.f32 %v1278_v26, %v865_v3 }
 0x255   : > { %590 = vrot.lane.b32.xlu1 %v1895_v4, %s1555_s11  ;;  %658 = vrot.lane.b32.xlu0 %v1910_v14, %s1552_s19 }
 0x259   : > { %656 = vrot.lane.b32.xlu1 %v1910_v14, %s1550_s7  ;;  %662 = vrot.lane.b32.xlu0 %v1910_v14, %s1553_s24 }
 0x25d   : > { %660 = vrot.lane.b32.xlu1 %v1910_v14, %s1554_s14  ;;  %728 = vrot.lane.b32.xlu0 %v1925_v21, %s1551_s3 }
 0x261   : > { %664 = vrot.lane.b32.xlu1 %v1910_v14, %s1555_s11  ;;  %732 = vrot.lane.b32.xlu0 %v1925_v21, %s1552_s19 }
 0x265   : > { %730 = vrot.lane.b32.xlu1 %v1925_v21, %s1550_s7  ;;  %736 = vrot.lane.b32.xlu0 %v1925_v21, %s1553_s24 }
 0x269   : > { %734 = vrot.lane.b32.xlu1 %v1925_v21, %s1554_s14  ;;  %802 = vrot.lane.b32.xlu0 %v1940_v25, %s1551_s3 }
 0x26d   : > { %738 = vrot.lane.b32.xlu1 %v1925_v21, %s1555_s11  ;;  %806 = vrot.lane.b32.xlu0 %v1940_v25, %s1552_s19 }
 0x271   : > { %804 = vrot.lane.b32.xlu1 %v1940_v25, %s1550_s7  ;;  %810 = vrot.lane.b32.xlu0 %v1940_v25, %s1553_s24 }
 0x275   : > { %808 = vrot.lane.b32.xlu1 %v1940_v25, %s1554_s14  ;;  %876 = vrot.lane.b32.xlu0 %v1954_v27, %s1551_s3 }
 0x279   : > { %812 = vrot.lane.b32.xlu1 %v1940_v25, %s1555_s11  ;;  %880 = vrot.lane.b32.xlu0 %v1954_v27, %s1552_s19 }
 0x27d   : > { %878 = vrot.lane.b32.xlu1 %v1954_v27, %s1550_s7  ;;  %884 = vrot.lane.b32.xlu0 %v1954_v27, %s1553_s24 }
 0x281   : > { %882 = vrot.lane.b32.xlu1 %v1954_v27, %s1554_s14 }
 0x285   : > { %886 = vrot.lane.b32.xlu1 %v1954_v27, %s1555_s11 }
 0x2af   : > { %v498_v28 = vpop.permute.xlu1 %497  ;;  %v496_v29 = vpop.permute.xlu0 %495 }
 0x2b3   : > { %v500_v31 = vpop.permute.xlu1 %499  ;;  %v504_v32 = vpop.permute.xlu0 %503 }
 0x2b4   : > { %v516_v36 = vsel %vm459_vm0, %v504_v32, %v498_v28  ;;  %v522_v37 = vsel %vm462_vm1, %v498_v28, %v504_v32 }
 0x2b5   : > { %v517_v46 = vsel %vm460_vm2, %v1883_v60, %v516_v36  ;;  %v525_v47 = vsel %vm463_vm3, %v1883_v60, %v522_v37 }
 0x2b7   : > { %v502_v34 = vpop.permute.xlu1 %501  ;;  %v581_v35 = vpop.permute.xlu0 %580 }
 0x2b8   : > { %v518_v40 = vsel %vm459_vm0, %v502_v34, %v500_v31  ;;  %v521_v41 = vsel %vm462_vm1, %v500_v31, %v502_v34 }
 0x2b9   : > { %v537_v50 = vmin.f32 %v518_v40, %v521_v41  ;;  %v538_v53 = vmax.f32 %v518_v40, %v521_v41 }
 0x2bb   : > { %v506_v38 = vpop.permute.xlu1 %505  ;;  %v585_v39 = vpop.permute.xlu0 %584 }
 0x2bc   : > { %v509_v42 = vsel %vm459_vm0, %v506_v38, %v496_v29  ;;  %v526_v43 = vsel %vm462_vm1, %v496_v29, %v506_v38 }
 0x2bd   : > { %v512_v44 = vsel %vm460_vm2, %v502_v34, %v509_v42  ;;  %v527_v45 = vsel %vm463_vm3, %v500_v31, %v526_v43 }
 0x2be   : > { %v515_v48 = vsel %vm461_vm4, %v500_v31, %v512_v44  ;;  %v530_v49 = vsel %vm464_vm5, %v502_v34, %v527_v45 }
 0x2bf   : > { %v531_v51 = vmin.f32 %v515_v48, %v525_v47  ;;  %v536_v52 = vmax.f32 %v517_v46, %v530_v49  ;;  %v583_v54 = vpop.permute.xlu1 %582  ;;  %v589_v55 = vpop.permute.xlu0 %588  ;;  %v532_v56 = vmax.f32 %v515_v48, %v525_v47  ;;  %v535_v62 = vmin.f32 %v517_v46, %v530_v49 }
 0x2c0   : > { %v599_v23 = vsel %vm462_vm1, %v583_v54, %v589_v55  ;;  %v595_v37 = vsel %vm459_vm0, %v589_v55, %v583_v54 }
 0x2c1   : > { %v533_v57 = vmin.f32 %v531_v51, %v1883_v60  ;;  %v534_v58 = vmax.f32 %v531_v51, %v1883_v60  ;;  %v542_v59 = vmin.f32 %v537_v50, %v536_v52  ;;  %v543_v61 = vmax.f32 %v537_v50, %v536_v52 }
 0x2c2   : > { %v600_v29 = vsel %vm463_vm3, %v1895_v4, %v599_v23  ;;  %v596_v47 = vsel %vm460_vm2, %v1895_v4, %v595_v37 }
 0x2c3   : > { %v540_v63 = vmin.f32 %v534_v58, %v532_v56  ;;  %v541_v0 = vmax.f32 %v534_v58, %v532_v56  ;;  %v587_v1 = vpop.permute.xlu1 %586  ;;  %v655_v2 = vpop.permute.xlu0 %654  ;;  %v539_v3 = vmax.f32 %v533_v57, %v535_v62 }
 0x2c4   : > { %v598_v43 = vsel %vm462_vm1, %v585_v39, %v587_v1 }
 0x2c5   : > { %v544_v5 = vmax.f32 %v542_v59, %v540_v63  ;;  %v546_v6 = vmin.f32 %v538_v53, %v541_v0 }
 0x2c7   : > { %v545_v7 = vmin.f32 %v544_v5, %v543_v61  ;;  %v547_v8 = vmin.f32 %v539_v3, %v546_v6  ;;  %v548_v9 = vmax.f32 %v539_v3, %v546_v6  ;;  %v591_v10 = vpop.permute.xlu1 %590  ;;  %v659_v11 = vpop.permute.xlu0 %658 }
 0x2c8   : > { %v592_v16 = vsel %vm459_vm0, %v591_v10, %v581_v35  ;;  %v601_v26 = vsel %vm462_vm1, %v581_v35, %v591_v10  ;;  %v597_v35 = vsel %vm459_vm0, %v587_v1, %v585_v39 }
 0x2c9   : > { %v549_v12 = vmax.f32 %v547_v8, %v545_v7  ;;  %v593_v20 = vsel %vm460_vm2, %v587_v1, %v592_v16  ;;  %v602_v32 = vsel %vm463_vm3, %v585_v39, %v601_v26  ;;  %v610_v51 = vmin.f32 %v597_v35, %v598_v43 }
 0x2ca   : > { %v594_v24 = vsel %vm461_vm4, %v585_v39, %v593_v20  ;;  %v603_v38 = vsel %vm464_vm5, %v587_v1, %v602_v32  ;;  %v611_v61 = vmax.f32 %v597_v35, %v598_v43 }
 0x2cb   : > { %v2008_v13 = vmin.f32 %v549_v12, %v548_v9  ;;  %v657_v60 = vpop.permute.xlu1 %656  ;;  %v663_v15 = vpop.permute.xlu0 %662  ;;  %v604_v34 = vmin.f32 %v594_v24, %v600_v29  ;;  %v605_v48 = vmax.f32 %v594_v24, %v600_v29  ;;  %v609_v49 = vmax.f32 %v596_v47, %v603_v38 }
 0x2cc   : > { %v673_v40 = vsel %vm462_vm1, %v657_v60, %v663_v15  ;;  %v669_v58 = vsel %vm459_vm0, %v663_v15, %v657_v60  ;;  %v608_v53 = vmin.f32 %v596_v47, %v603_v38 }
 0x2cd   : > { %v607_v44 = vmax.f32 %v604_v34, %v1895_v4  ;;  %v674_v50 = vsel %vm463_vm3, %v1910_v14, %v673_v40  ;;  %v606_v63 = vmin.f32 %v604_v34, %v1895_v4  ;;  %v615_v0 = vmin.f32 %v610_v51, %v609_v49 }
 0x2ce   : > { %v670_v3 = vsel %vm460_vm2, %v1910_v14, %v669_v58  ;;  %v616_v23 = vmax.f32 %v610_v51, %v609_v49 }
 0x2cf   : > { %v661_v17 = vpop.permute.xlu1 %660  ;;  %v729_v19 = vpop.permute.xlu0 %728  ;;  %v613_v56 = vmin.f32 %v607_v44, %v605_v48  ;;  %v614_v57 = vmax.f32 %v607_v44, %v605_v48 }
 0x2d0   : > { %v671_v5 = vsel %vm459_vm0, %v661_v17, %v659_v11  ;;  %v672_v12 = vsel %vm462_vm1, %v659_v11, %v661_v17 }
 0x2d1   : > { %v617_v9 = vmax.f32 %v615_v0, %v613_v56  ;;  %v2081_v10 = vmin.f32 %v611_v61, %v614_v57  ;;  %v684_v26 = vmin.f32 %v671_v5, %v672_v12 }
 0x2d3   : > { %v665_v18 = vpop.permute.xlu1 %664  ;;  %v2014_v22 = vpop.permute.xlu0 %732  ;;  %v618_v32 = vmin.f32 %v617_v9, %v616_v23 }
 0x2d4   : > { %v666_v28 = vsel %vm459_vm0, %v665_v18, %v655_v2  ;;  %v675_v46 = vsel %vm462_vm1, %v655_v2, %v665_v18  ;;  %v2090_v18 = vmax.f32 %v606_v63, %v608_v53 }
 0x2d5   : > { %v667_v36 = vsel %vm460_vm2, %v661_v17, %v666_v28  ;;  %v676_v39 = vsel %vm463_vm3, %v659_v11, %v675_v46 }
 0x2d6   : > { %v668_v45 = vsel %vm461_vm4, %v659_v11, %v667_v36  ;;  %v677_v1 = vsel %vm464_vm5, %v661_v17, %v676_v39  ;;  %v620_v34 = vmin.f32 %v2090_v18, %v2081_v10  ;;  %v685_v36 = vmax.f32 %v671_v5, %v672_v12 }
 0x2d7   : > { %v731_v30 = vpop.permute.xlu1 %730  ;;  %v737_v31 = vpop.permute.xlu0 %736  ;;  %v2056_v52 = vmin.f32 %v668_v45, %v674_v50  ;;  %v679_v15 = vmax.f32 %v668_v45, %v674_v50  ;;  %v683_v16 = vmax.f32 %v670_v3, %v677_v1  ;;  %v682_v35 = vmin.f32 %v670_v3, %v677_v1 }
 0x2d8   : > { %v747_v2 = vsel %vm462_vm1, %v731_v30, %v737_v31  ;;  %v743_v37 = vsel %vm459_vm0, %v737_v31, %v731_v30 }
 0x2d9   : > { %v681_v6 = vmax.f32 %v2056_v52, %v1910_v14  ;;  %v748_v20 = vsel %vm463_vm3, %v1925_v21, %v747_v2  ;;  %v689_v38 = vmin.f32 %v684_v26, %v683_v16  ;;  %v680_v44 = vmin.f32 %v2056_v52, %v1910_v14 }
 0x2da   : > { %v744_v48 = vsel %vm460_vm2, %v1925_v21, %v743_v37  ;;  %v690_v3 = vmax.f32 %v684_v26, %v683_v16  ;;  %v622_v37 = vmax.f32 %v620_v34, %v618_v32 }
 0x2db   : > { %v735_v41 = vpop.permute.xlu1 %734  ;;  %v2039_v42 = vpop.permute.xlu0 %802  ;;  %v687_v28 = vmin.f32 %v681_v6, %v679_v15  ;;  %v688_v29 = vmax.f32 %v681_v6, %v679_v15  ;;  %v686_v2 = vmax.f32 %v680_v44, %v682_v35 }
 0x2dc   : > { %v745_v40 = vsel %vm459_vm0, %v735_v41, %v2014_v22  ;;  %v746_v43 = vsel %vm462_vm1, %v2014_v22, %v735_v41 }
 0x2dd   : > { %v691_v31 = vmax.f32 %v689_v38, %v687_v28  ;;  %v2117_v47 = vmin.f32 %v685_v36, %v688_v29  ;;  %v759_v5 = vmax.f32 %v745_v40, %v746_v43 }
 0x2df   : > { %v739_v54 = vpop.permute.xlu1 %738  ;;  %v2058_v55 = vpop.permute.xlu0 %806  ;;  %v694_v15 = vmin.f32 %v686_v2, %v2117_v47 }
 0x2e0   : > { %v740_v59 = vsel %vm459_vm0, %v739_v54, %v729_v19  ;;  %v749_v60 = vsel %vm462_vm1, %v729_v19, %v739_v54 }
 0x2e1   : > { %v741_v62 = vsel %vm460_vm2, %v735_v41, %v740_v59  ;;  %v750_v11 = vsel %vm463_vm3, %v2014_v22, %v749_v60  ;;  %v692_v60 = vmin.f32 %v691_v31, %v690_v3 }
 0x2e2   : > { %v742_v4 = vsel %vm461_vm4, %v2014_v22, %v741_v62  ;;  %v751_v45 = vsel %vm464_vm5, %v735_v41, %v750_v11  ;;  %v758_v41 = vmin.f32 %v745_v40, %v746_v43 }
 0x2e3   : > { %v805_v7 = vpop.permute.xlu1 %804  ;;  %v811_v8 = vpop.permute.xlu0 %810  ;;  %v2092_v24 = vmin.f32 %v742_v4, %v748_v20  ;;  %v753_v50 = vmax.f32 %v742_v4, %v748_v20  ;;  %v757_v52 = vmax.f32 %v744_v48, %v751_v45  ;;  %v756_v20 = vmin.f32 %v744_v48, %v751_v45 }
 0x2e4   : > { %v817_v30 = vsel %vm459_vm0, %v811_v8, %v805_v7  ;;  %v821_v22 = vsel %vm462_vm1, %v805_v7, %v811_v8  ;;  %v696_v40 = vmax.f32 %v694_v15, %v692_v60 }
 0x2e5   : > { %v755_v46 = vmax.f32 %v2092_v24, %v1925_v21  ;;  %v818_v54 = vsel %vm460_vm2, %v1940_v25, %v817_v30  ;;  %v822_v59 = vsel %vm463_vm3, %v1940_v25, %v821_v22  ;;  %v754_v4 = vmin.f32 %v2092_v24, %v1925_v21 }
 0x2e6   : > { %v763_v7 = vmin.f32 %v758_v41, %v757_v52  ;;  %v621_v24 = vmax.f32 %v2090_v18, %v2081_v10  ;;  %v764_v38 = vmax.f32 %v758_v41, %v757_v52 }
 0x2e7   : > { %v809_v17 = vpop.permute.xlu1 %808  ;;  %v2097_v19 = vpop.permute.xlu0 %876  ;;  %v761_v58 = vmin.f32 %v755_v46, %v753_v50  ;;  %v762_v53 = vmax.f32 %v755_v46, %v753_v50  ;;  %v760_v35 = vmax.f32 %v754_v4, %v756_v20 }
 0x2e8   : > { %v819_v62 = vsel %vm459_vm0, %v809_v17, %v2058_v55  ;;  %v820_v63 = vsel %vm462_vm1, %v2058_v55, %v809_v17 }
 0x2e9   : > { %v832_v23 = vmin.f32 %v819_v62, %v820_v63  ;;  %v767_v28 = vmin.f32 %v759_v5, %v762_v53  ;;  %v833_v26 = vmax.f32 %v819_v62, %v820_v63 }
 0x2eb   : > { %v813_v14 = vpop.permute.xlu1 %812  ;;  %v2124_v49 = vpop.permute.xlu0 %880  ;;  %v768_v30 = vmin.f32 %v760_v35, %v767_v28 }
 0x2ec   : > { %v814_v51 = vsel %vm459_vm0, %v813_v14, %v2039_v42  ;;  %v823_v39 = vsel %vm462_vm1, %v2039_v42, %v813_v14 }
 0x2ed   : > { %v815_v56 = vsel %vm460_vm2, %v809_v17, %v814_v51  ;;  %v824_v57 = vsel %vm463_vm3, %v2058_v55, %v823_v39 }
 0x2ee   : > { %v816_v42 = vsel %vm461_vm4, %v2058_v55, %v815_v56  ;;  %v825_v61 = vsel %vm464_vm5, %v809_v17, %v824_v57  ;;  %v765_v55 = vmax.f32 %v763_v7, %v761_v58  ;;  %v623_v57 = vmin.f32 %v622_v37, %v621_v24 }
 0x2ef   : > { %v826_v0 = vmin.f32 %v816_v42, %v822_v59  ;;  %v879_v1 = vpop.permute.xlu1 %878  ;;  %v831_v6 = vmax.f32 %v818_v54, %v825_v61  ;;  %v827_v8 = vmax.f32 %v816_v42, %v822_v59  ;;  %v885_v12 = vpop.permute.xlu0 %884  ;;  %v830_v43 = vmin.f32 %v818_v54, %v825_v61 }
 0x2f0   : > { %v895_v21 = vsel %vm462_vm1, %v879_v1, %v885_v12  ;;  %v766_v46 = vmin.f32 %v765_v55, %v764_v38  ;;  %v891_v31 = vsel %vm459_vm0, %v885_v12, %v879_v1  ;;  %v695_v58 = vmax.f32 %v686_v2, %v2117_v47 }
 0x2f1   : > { %v829_v9 = vmax.f32 %v826_v0, %v1940_v25  ;;  %v828_v17 = vmin.f32 %v826_v0, %v1940_v25  ;;  %v837_v36 = vmin.f32 %v832_v23, %v831_v6  ;;  %v896_v25 = vsel %vm463_vm3, %v1954_v27, %v895_v21 }
 0x2f2   : > { %v838_v14 = vmax.f32 %v832_v23, %v831_v6  ;;  %v892_v54 = vsel %vm460_vm2, %v1954_v27, %v891_v31  ;;  %v770_v59 = vmax.f32 %v768_v30, %v766_v46  ;;  %v769_v0 = vmax.f32 %v760_v35, %v767_v28 }
 0x2f3   : > { %v835_v29 = vmin.f32 %v829_v9, %v827_v8  ;;  %v836_v11 = vmax.f32 %v829_v9, %v827_v8  ;;  %v883_v16 = vpop.permute.xlu1 %882  ;;  %v834_v22 = vmax.f32 %v828_v17, %v830_v43  ;;  %v624_v7 = vadd.f32 %v623_v57, %v2008_v13 }
 0x2f4   : > { %v893_v32 = vsel %vm459_vm0, %v883_v16, %v2124_v49  ;;  %v894_v34 = vsel %vm462_vm1, %v2124_v49, %v883_v16  ;;  %v771_v47 = vmin.f32 %v770_v59, %v769_v0 }
 0x2f5   : > { %v839_v44 = vmax.f32 %v837_v36, %v835_v29  ;;  %v841_v45 = vmin.f32 %v833_v26, %v836_v11  ;;  %v906_v61 = vmin.f32 %v893_v32, %v894_v34  ;;  %v907_v3 = vmax.f32 %v893_v32, %v894_v34 }
 0x2f7   : > { %v887_v48 = vpop.permute.xlu1 %886  ;;  %v840_v51 = vmin.f32 %v839_v44, %v838_v14  ;;  %v842_v39 = vmin.f32 %v834_v22, %v841_v45  ;;  %v843_v2 = vmax.f32 %v834_v22, %v841_v45 }
 0x2f8   : > { %v888_v10 = vsel %vm459_vm0, %v887_v48, %v2097_v19  ;;  %v897_v18 = vsel %vm462_vm1, %v2097_v19, %v887_v48 }
 0x2f9   : > { %v889_v41 = vsel %vm460_vm2, %v883_v16, %v888_v10  ;;  %v898_v50 = vsel %vm463_vm3, %v2124_v49, %v897_v18  ;;  %v844_v1 = vmax.f32 %v842_v39, %v840_v51 }
 0x2fa   : > { %v890_v19 = vsel %vm461_vm4, %v2124_v49, %v889_v41  ;;  %v899_v52 = vsel %vm464_vm5, %v883_v16, %v898_v50  ;;  %v697_v49 = vmin.f32 %v696_v40, %v695_v58 }
 0x2fb   : > { %v900_v56 = vmin.f32 %v890_v19, %v896_v25  ;;  %v905_v42 = vmax.f32 %v892_v54, %v899_v52  ;;  %v901_v53 = vmax.f32 %v890_v19, %v896_v25  ;;  %v904_v5 = vmin.f32 %v892_v54, %v899_v52 }
 0x2fc   : > { %v698_v15 = vadd.f32 %v697_v49, %v624_v7 }
 0x2fd   : > { %v902_v62 = vmin.f32 %v900_v56, %v1954_v27  ;;  %v903_v63 = vmax.f32 %v900_v56, %v1954_v27  ;;  %v911_v4 = vmin.f32 %v906_v61, %v905_v42  ;;  %v912_v9 = vmax.f32 %v906_v61, %v905_v42 }
 0x2fe   : > { %v845_v27 = vmin.f32 %v844_v1, %v843_v2  ;;  %v772_v29 = vadd.f32 %v771_v47, %v698_v15 }
 0x2ff   : > { %v909_v33 = vmin.f32 %v903_v63, %v901_v53  ;;  %v910_v6 = vmax.f32 %v903_v63, %v901_v53  ;;  %v908_v8 = vmax.f32 %v902_v62, %v904_v5 }
 0x300   : > { %v846_v11 = vadd.f32 %v845_v27, %v772_v29 }
 0x301   : > { %v913_v12 = vmax.f32 %v911_v4, %v909_v33  ;;  %v915_v60 = vmin.f32 %v907_v3, %v910_v6 }
 0x303   : > { %v914_v20 = vmin.f32 %v913_v12, %v912_v9  ;;  %v916_v23 = vmin.f32 %v908_v8, %v915_v60  ;;  %v917_v55 = vmax.f32 %v908_v8, %v915_v60 }
 0x305   : > { %v918_v28 = vmax.f32 %v916_v23, %v914_v20 }
 0x307   : > { %v919_v16 = vmin.f32 %v918_v28, %v917_v55 }
 0x309   : > { %v920_v13 = vadd.f32 %v919_v16, %v846_v11 }
 0x30b   : > { %v921_v26 = vmul.f32 0.16666667, %v920_v13 }
 0x30d   : > { %v922_v17 = vsub.f32 0.0, %v921_v26 }
 0x30f   : > { %923 = vst [vmem:[%s456_s26 - $0x3] sm:$0x78] %v922_v17 }
 0x310   : > { %1477 = shalt.err (!%p1474_p6)
}
 0x311   : > { %s1478_s29 = scalar_lea.hbm %s2202_s0, 64  ;;  %s1482_s15 = scalar_lea.hbm %s2252_s6, 128 }
 0x312   : > { %p1479_p9 = scmp.ne.s32.totalorder %s2202_s0, %s1478_s29  ;;  %p1483_p13 = scmp.lt.u32.totalorder %s2202_s0, %s2252_s6 }
 0x313   : > { %p1484_p8 = scmp.lt.u32.totalorder %s1482_s15, %s1478_s29  ;;  %p1486_p11 = scmp.lt.u32.totalorder %s1478_s29, %s2202_s0 }
 0x314   : > { %p1480_p3 = pnand %p1479_p9, %p2286_p0 }
 0x315   : > { %p1485_p1 = por %p1484_p8, %p1483_p13 }
 0x316   : > { %p1481_p7 = pneg %p1480_p3 }
 0x317   : > { %p1487_p10 = por %p1486_p11, %p1485_p1 }
 0x319   : > { %p1488_p12 = pnand %p1487_p10, %p1481_p7 }
 0x31b   : > { %1491 = shalt.err (!%p1488_p12)
}
 0x31c   : > { %1178 = dma.vmem_to_hbm [thread:$0]  (%p2286_p0), %s2204_s27, 64, %s2202_s0, %s925_s13  }
 0x31d PF: > { %s2287_s7 = sld [smem:[#allocation20_spill]]  ;;  %s950_s3 = sand.u32 1, %s1530_s21  }
 0x31e   : > { %p2288_p5 = scmp.ne.s32.totalorder %s2271_s9, 0  ;;  %s951_s19 = scalar_lea.sflag [#allocation4], %s950_s3 }
 0x323   : > { %p2289_p4 = scmp.ge.s32.totalorder %s2287_s7, 2 }
 0x325   : > { %p1200_p2 = pnand %p2289_p4, %p2288_p5 }
 0x327   : > { %1525 = dma.done.wait (!%p1200_p2), %s951_s19, 64  }
 0x328   : > { %1527 = vsyncadd (!%p1200_p2), %s951_s19, 4294967232  ;;  %s2290_s24 = sld [smem:[#allocation21_spill]]  ;;  %s2291_s14 = sld [smem:[#allocation19_spill]] }
 0x329   : > { %s2292_s23 = sld [smem:[#allocation22_spill]]  ;;  %s2293_s21 = smov %s1534_s22 }
 0x32e   : > { %p28_p6 = scmp.ge.s32.totalorder %s2290_s24, 4   ;;  %s2294_s22 = smov %s2291_s14 }
 0x330   :  { %30 = sbr.rel (!%p28_p6) target bundleno = 16 (0x10), region = 150 }
 0x337   :  { %956 = vsyncpa [#allocation3], 1 }
 0x338   :  { %958 = vsyncpa [#allocation3 + $0x1], 1 }
 0x339   :  { %959 = vsyncpa [#allocation6], 1 }
 0x33a   :  { %961 = vsyncpa [#allocation6 + $0x1], 1 }
 0x33b   :  { %962 = vsyncpa [#allocation9], 1 }
 0x33c   :  { %964 = vsyncpa [#allocation9 + $0x1], 1 }
 0x33d   :  { %965 = vsyncpa [#allocation12], 1 }
 0x33e   :  { %967 = vsyncpa [#allocation12 + $0x1], 1 }
 0x33f   :  { %968 = vsyncpa [#allocation4], 1 }
 0x340   :  { %970 = vsyncpa [#allocation4 + $0x1], 1 }

</bundles_post_ra>
